<compile_context>
chip_gen: v6e
topology: v6e:2x2x1
jax: 0.10.0
libtpu: 0.0.40
codegen_flags: <defaults>
</compile_context>

<pallas_src>
import functools

import jax
import jax.numpy as jnp
import numpy as np
from jax.experimental import pallas as pl
from jax.experimental.pallas import tpu as pltpu

EPS = 1e-5


def _round_up(v, m):
    return (v + m - 1) // m * m


def _make_conv_block_kernel(n_batch, length, lp2, b_tile, cp_in, cp_out,
                            matmul_dtype):
    """3-phase kernel for fixed (static) problem sizes."""
    rows = b_tile * lp2
    inv_count = 1.0 / float(n_batch * length)   # BN divisor: N * L (biased var)

    def conv3(xf, w_ref, bias):
        # xf: (rows, Cp) in matmul dtype, with zero halo rows per sample.
        # Tap-accumulated conv: y[r] = x[r-1]@W0 + x[r]@W1 + x[r+1]@W2 + b.
        zero = jnp.zeros((1, xf.shape[1]), xf.dtype)
        xm1 = jnp.concatenate([zero, xf[:-1, :]], axis=0)   # x[r-1]
        xp1 = jnp.concatenate([xf[1:, :], zero], axis=0)    # x[r+1]
        y = jnp.dot(xm1, w_ref[0], preferred_element_type=jnp.float32)
        y = y + jnp.dot(xf, w_ref[1], preferred_element_type=jnp.float32)
        y = y + jnp.dot(xp1, w_ref[2], preferred_element_type=jnp.float32)
        return y + bias

    def valid_mask(t):
        # 1.0 on rows that belong to a real sample's valid positions (1..L
        # within its Lp2 slab), 0.0 on halo / pad rows and padded samples.
        pos = jax.lax.broadcasted_iota(jnp.int32, (b_tile, lp2, 1), 1)
        smp = jax.lax.broadcasted_iota(jnp.int32, (b_tile, lp2, 1), 0)
        nvalid = n_batch - t * b_tile
        ok = jnp.logical_and(jnp.logical_and(pos >= 1, pos <= length),
                             smp < nvalid)
        return ok.astype(jnp.float32).reshape(rows, 1)

    def bn_coeffs(sum_row, sq_row, g, be):
        mean = sum_row * inv_count
        var = jnp.maximum(sq_row * inv_count - mean * mean, 0.0)  # clamp
        scale = g * jax.lax.rsqrt(var + EPS)                      # EUP rsqrt
        shift = be - mean * scale
        return scale, shift

    def kernel(x_ref, w1_ref, b1_ref, g1_ref, be1_ref,
               w2_ref, b2_ref, g2_ref, be2_ref,
               o_ref, y_sc, stats_sc):
        p = pl.program_id(0)   # phase
        t = pl.program_id(1)   # sample tile

        @pl.when(jnp.logical_and(p == 0, t == 0))
        def _init():
            stats_sc[...] = jnp.zeros(stats_sc.shape, stats_sc.dtype)

        @pl.when(p == 0)
        def _phase_conv1():
            xf = x_ref[0]                                   # (rows, Cp_in)
            y1 = conv3(xf, w1_ref, b1_ref[...])             # (rows, Cp_out) f32
            mask = valid_mask(t)
            ym = y1 * mask
            stats_sc[0:1, :] += jnp.sum(ym, axis=0, keepdims=True)
            stats_sc[1:2, :] += jnp.sum(ym * y1, axis=0, keepdims=True)
            y_sc[t] = y1.astype(y_sc.dtype)

        @pl.when(p == 1)
        def _phase_bn1_relu1_conv2():
            @pl.when(t == 0)
            def _coeffs1():   # hoisted: computed once, reused by all tiles
                s, sh = bn_coeffs(stats_sc[0:1, :], stats_sc[1:2, :],
                                  g1_ref[...], be1_ref[...])
                stats_sc[4:5, :] = s
                stats_sc[5:6, :] = sh
            mask = valid_mask(t)
            y1 = y_sc[t].astype(jnp.float32)
            # Mask zeroes halo/pad rows -> correct zero padding for conv2.
            h = jnp.maximum(y1 * stats_sc[4:5, :] + stats_sc[5:6, :], 0.0) * mask
            y2 = conv3(h.astype(matmul_dtype), w2_ref, b2_ref[...])
            ym = y2 * mask
            stats_sc[2:3, :] += jnp.sum(ym, axis=0, keepdims=True)
            stats_sc[3:4, :] += jnp.sum(ym * y2, axis=0, keepdims=True)
            y_sc[t] = y2.astype(y_sc.dtype)                 # overwrite in place

        @pl.when(p == 2)
        def _phase_bn2_relu2_store():
            @pl.when(t == 0)
            def _coeffs2():
                s, sh = bn_coeffs(stats_sc[2:3, :], stats_sc[3:4, :],
                                  g2_ref[...], be2_ref[...])
                stats_sc[6:7, :] = s
                stats_sc[7:8, :] = sh
            y2 = y_sc[t].astype(jnp.float32)
            z = jnp.maximum(y2 * stats_sc[6:7, :] + stats_sc[7:8, :], 0.0)
            # Strip halo rows in-kernel: only the L valid rows per sample hit HBM.
            for b in range(b_tile):
                o_ref[b] = z[b * lp2 + 1: b * lp2 + 1 + length, :].astype(o_ref.dtype)

    return kernel


@functools.partial(jax.jit, static_argnames=("matmul_dtype",))
def conv_block(x, params, matmul_dtype=jnp.bfloat16):
    """x: (N, C_in, L) float32 -> (N, C_out, L) float32."""
    n, c_in, length = x.shape
    c_out = params['w1'].shape[1]
    cp_in = _round_up(c_in, 128)
    cp_out = _round_up(c_out, 128)
    lp2 = _round_up(length + 2, 16)            # per-sample slab (halo + pad rows)

    # Fold samples into each tile so the matmul M dimension is ~512 rows.
    b_tile = max(1, min(n, 512 // lp2))
    t_tiles = -(-n // b_tile)
    n_pad = t_tiles * b_tile
    rows = b_tile * lp2

    f32_path = jnp.dtype(matmul_dtype) == jnp.dtype(jnp.float32)
    y_dtype = jnp.float32 if f32_path else jnp.bfloat16   # intermediate scratch

    # ---------- host-side packing (lane-dense, channel-padded, tap-split W) ----------
    xt = jnp.transpose(x, (0, 2, 1)).astype(matmul_dtype)          # (N, L, Cin)
    x_p = jnp.zeros((n_pad, lp2, cp_in), matmul_dtype)
    x_p = x_p.at[:n, 1:length + 1, :c_in].set(xt)
    x_p = x_p.reshape(t_tiles, rows, cp_in)

    def pack_w(w, ci, cpi):
        # w: (3, Cout, ci) -> (3, cpi, cp_out); tap k holds w[k].T
        wp = jnp.zeros((3, cpi, cp_out), jnp.float32)
        wp = wp.at[:, :ci, :c_out].set(jnp.transpose(w, (0, 2, 1)))
        return wp.astype(matmul_dtype)

    def pack_vec(v):
        vec = jnp.reshape(v, (-1,))[:c_out].astype(jnp.float32)
        return jnp.zeros((1, cp_out), jnp.float32).at[0, :c_out].set(vec)

    w1p = pack_w(params['w1'], c_in, cp_in)
    w2p = pack_w(params['w2'], c_out, cp_out)
    b1p, g1p, be1p = (pack_vec(params[k]) for k in ('b1', 'g1', 'be1'))
    b2p, g2p, be2p = (pack_vec(params[k]) for k in ('b2', 'g2', 'be2'))

    kernel = _make_conv_block_kernel(n, length, lp2, b_tile, cp_in, cp_out,
                                     matmul_dtype)

    # Explicit VMEM budget (scoped defaults are 16/32 MiB) with headroom.
    itm = jnp.dtype(matmul_dtype).itemsize
    ity = jnp.dtype(y_dtype).itemsize
    need = (t_tiles * rows * cp_out * ity                # full-batch intermediate
            + 8 * cp_out * 4                             # stats / BN coeffs
            + 2 * rows * cp_in * itm                     # x blocks (double-buffered)
            + 2 * b_tile * length * cp_out * 4           # out blocks
            + 2 * 3 * (cp_in + cp_out) * cp_out * itm    # w1 + w2
            + 2 * 6 * cp_out * 4                         # bias / gamma / beta
            + 10 * rows * max(cp_in, cp_out) * 4)        # in-phase temporaries
    vmem_limit = int(min(100 * 2 ** 20, max(32 * 2 ** 20, 2 * need)))

    def const_spec(shape):
        return pl.BlockSpec(shape, lambda *_: (0,) * len(shape))

    out_p = pl.pallas_call(
        kernel,
        out_shape=jax.ShapeDtypeStruct((n_pad, length, cp_out), jnp.float32),
        grid_spec=pltpu.PrefetchScalarGridSpec(
            num_scalar_prefetch=0,
            grid=(3, t_tiles),                           # (phase, sample tile)
            in_specs=[
                # x is only consumed in phase 0; pin the block index afterwards
                # so phases 1/2 do not keep re-DMAing the input.
                pl.BlockSpec((1, rows, cp_in),
                             lambda p, t: (jnp.where(p == 0, t, 0), 0, 0)),
                const_spec((3, cp_in, cp_out)),          # w1 (tap-split)
                const_spec((1, cp_out)),                 # b1
                const_spec((1, cp_out)),                 # gamma1
                const_spec((1, cp_out)),                 # beta1
                const_spec((3, cp_out, cp_out)),         # w2 (tap-split)
                const_spec((1, cp_out)),                 # b2
                const_spec((1, cp_out)),                 # gamma2
                const_spec((1, cp_out)),                 # beta2
            ],
            # Output is only produced in phase 2; pin the index elsewhere.
            out_specs=pl.BlockSpec((b_tile, length, cp_out),
                                   lambda p, t: (jnp.where(p == 2, t, 0), 0, 0)),
            scratch_shapes=[
                pltpu.VMEM((t_tiles, rows, cp_out), y_dtype),   # y1 then y2
                pltpu.VMEM((8, cp_out), jnp.float32),           # sums/sumsqs + coeffs
            ]),
        compiler_params=pltpu.CompilerParams(
            # Training-mode BN is a global (N, L) reduction and the intermediate
            # lives in scratch -> both axes must run sequentially.
            dimension_semantics=("arbitrary", "arbitrary"),
            vmem_limit_bytes=vmem_limit),
    )(x_p, w1p, b1p, g1p, be1p, w2p, b2p, g2p, be2p)

    return jnp.transpose(out_p[:n, :, :c_out], (0, 2, 1))


def init_params(key, ch_in, ch_out):
    k1, k2, k3, k4 = jax.random.split(key, 4)
    scale1 = 1.0 / np.sqrt(ch_in * 3)
    scale2 = 1.0 / np.sqrt(ch_out * 3)
    return {
        # conv weights stored tap-major: (3, C_out, C_in)
        'w1': jax.random.normal(k1, (3, ch_out, ch_in), jnp.float32) * scale1,
        'b1': jax.random.normal(k2, (ch_out, 1), jnp.float32) * scale1,
        'g1': jnp.ones((ch_out, 1), jnp.float32),
        'be1': jnp.zeros((ch_out, 1), jnp.float32),
        'w2': jax.random.normal(k3, (3, ch_out, ch_out), jnp.float32) * scale2,
        'b2': jax.random.normal(k4, (ch_out, 1), jnp.float32) * scale2,
        'g2': jnp.ones((ch_out, 1), jnp.float32),
        'be2': jnp.zeros((ch_out, 1), jnp.float32),
    }


def ref_forward(x, p):
    """Pure-JAX reference (no Pallas) matching the PyTorch module."""
    def conv(x, w, b):  # w: (3, Cout, Cin)
        wt = jnp.transpose(w, (1, 2, 0))  # (Cout, Cin, 3)
        y = jax.lax.conv_general_dilated(
            x, wt, window_strides=(1,), padding=((1, 1),),
            dimension_numbers=('NCH', 'OIH', 'NCH'))
        return y + b[None, :, :]

    def bn_relu(y, g, be):
        m = jnp.mean(y, axis=(0, 2), keepdims=True)
        v = jnp.mean((y - m) ** 2, axis=(0, 2), keepdims=True)
        y = (y - m) / jnp.sqrt(v + EPS) * g[None] + be[None]
        return jnp.maximum(y, 0.0)

    h = bn_relu(conv(x, p['w1'], p['b1']), p['g1'], p['be1'])
    return bn_relu(conv(h, p['w2'], p['b2']), p['g2'], p['be2'])


if __name__ == "__main__":
    key = jax.random.PRNGKey(0)
    kx, kp, kx2 = jax.random.split(key, 3)

    N, CH_IN, CH_OUT, L = 2, 4, 8, 16
    x = jax.random.normal(kx, (N, CH_IN, L), jnp.float32)
    params = init_params(kp, CH_IN, CH_OUT)

    ref = jax.block_until_ready(ref_forward(x, params))

    # Strict correctness gate with f32 MXU operands / f32 intermediates.
    out_f32 = jax.block_until_ready(
        conv_block(x, params, matmul_dtype=jnp.float32))
    np.testing.assert_allclose(np.asarray(out_f32), np.asarray(ref),
                               rtol=1e-4, atol=1e-4)

    # Default perf path: bf16 MXU operands + bf16 intermediate scratch
    # (f32 accumulation / BN / ReLU) — looser sanity check.
    out_bf16 = jax.block_until_ready(conv_block(x, params))
    np.testing.assert_allclose(np.asarray(out_bf16), np.asarray(ref),
                               rtol=1e-1, atol=1e-1)

    # Multi-tile / ragged-batch path (last sample tile partially filled).
    N2 = 18
    x2 = jax.random.normal(kx2, (N2, CH_IN, L), jnp.float32)
    ref2 = jax.block_until_ready(ref_forward(x2, params))
    out2 = jax.block_until_ready(
        conv_block(x2, params, matmul_dtype=jnp.float32))
    np.testing.assert_allclose(np.asarray(out2), np.asarray(ref2),
                               rtol=1e-4, atol=1e-4)

    print("KERNEL_OK")
</pallas_src>

<mosaic_0001>
module attributes {stable_mosaic.version = 11 : i64} {
  func.func @kernel(%arg0: i32, %arg1: i32, %arg2: memref<1x64x128xf32, #tpu.memory_space<vmem>>, %arg3: memref<3x128x128xf32, #tpu.memory_space<vmem>>, %arg4: memref<1x128xf32, #tpu.memory_space<vmem>>, %arg5: memref<1x128xf32, #tpu.memory_space<vmem>>, %arg6: memref<1x128xf32, #tpu.memory_space<vmem>>, %arg7: memref<3x128x128xf32, #tpu.memory_space<vmem>>, %arg8: memref<1x128xf32, #tpu.memory_space<vmem>>, %arg9: memref<1x128xf32, #tpu.memory_space<vmem>>, %arg10: memref<1x128xf32, #tpu.memory_space<vmem>>, %arg11: memref<2x16x128xf32, #tpu.memory_space<vmem>>, %arg12: memref<1x64x128xf32, #tpu.memory_space<vmem>>, %arg13: memref<8x128xf32, #tpu.memory_space<vmem>>) attributes {dimension_semantics = [#tpu.dimension_semantics<arbitrary>, #tpu.dimension_semantics<arbitrary>], iteration_bounds = array<i64: 3, 1>, scalar_prefetch = 0 : i64, scratch_operands = 2 : i64, tpu.core_type = #tpu.core_type<tc>, window_params = [{transform_indices = @transform_0, window_bounds = array<i64: 1, 64, 128>}, {pipeline_mode = #tpu.pipeline_mode<synchronous>, transform_indices = @transform_1, window_bounds = array<i64: 3, 128, 128>}, {pipeline_mode = #tpu.pipeline_mode<synchronous>, transform_indices = @transform_2, window_bounds = array<i64: 1, 128>}, {pipeline_mode = #tpu.pipeline_mode<synchronous>, transform_indices = @transform_3, window_bounds = array<i64: 1, 128>}, {pipeline_mode = #tpu.pipeline_mode<synchronous>, transform_indices = @transform_4, window_bounds = array<i64: 1, 128>}, {pipeline_mode = #tpu.pipeline_mode<synchronous>, transform_indices = @transform_5, window_bounds = array<i64: 3, 128, 128>}, {pipeline_mode = #tpu.pipeline_mode<synchronous>, transform_indices = @transform_6, window_bounds = array<i64: 1, 128>}, {pipeline_mode = #tpu.pipeline_mode<synchronous>, transform_indices = @transform_7, window_bounds = array<i64: 1, 128>}, {pipeline_mode = #tpu.pipeline_mode<synchronous>, transform_indices = @transform_8, window_bounds = array<i64: 1, 128>}, {transform_indices = @transform_9, window_bounds = array<i64: 2, 16, 128>}]} {
    %c0_i32 = arith.constant 0 : i32
    %0 = arith.cmpi eq, %arg0, %c0_i32 : i32
    %c0_i32_0 = arith.constant 0 : i32
    %1 = arith.cmpi eq, %arg1, %c0_i32_0 : i32
    %2 = arith.andi %0, %1 : i1
    %3 = arith.extui %2 : i1 to i32
    %c0_i32_1 = arith.constant 0 : i32
    %4 = arith.cmpi ne, %3, %c0_i32_1 : i32
    scf.if %4 {
      %cst = arith.constant 0.000000e+00 : f32
      %14 = vector.broadcast %cst : f32 to vector<8x128xf32>
      %c0 = arith.constant 0 : index
      %c0_6 = arith.constant 0 : index
      %15 = vector.load %arg13[%c0, %c0_6] : memref<8x128xf32, #tpu.memory_space<vmem>>, vector<8x128xf32>
      tpu.vector_store %arg13[%c0, %c0_6], %14 {strides = array<i32>} : memref<8x128xf32, #tpu.memory_space<vmem>>, vector<8x128xf32>,
    } else {
    }
    %c0_i32_2 = arith.constant 0 : i32
    %5 = arith.cmpi eq, %arg0, %c0_i32_2 : i32
    %6 = arith.extui %5 : i1 to i32
    %c0_i32_3 = arith.constant 0 : i32
    %7 = arith.cmpi ne, %6, %c0_i32_3 : i32
    scf.if %7 {
      %c0 = arith.constant 0 : index
      %c0_6 = arith.constant 0 : index
      %c0_7 = arith.constant 0 : index
      %14 = vector.load %arg2[%c0, %c0_6, %c0_7] : memref<1x64x128xf32, #tpu.memory_space<vmem>>, vector<1x64x128xf32>
      %15 = vector.shape_cast %14 : vector<1x64x128xf32> to vector<64x128xf32>
      %c0_8 = arith.constant 0 : index
      %c0_9 = arith.constant 0 : index
      %16 = vector.load %arg4[%c0_8, %c0_9] : memref<1x128xf32, #tpu.memory_space<vmem>>, vector<1x128xf32>
      %cst = arith.constant 0.000000e+00 : f32
      %17 = vector.broadcast %cst : f32 to vector<1x128xf32>
      %18 = vector.extract_strided_slice %15 {offsets = [0, 0], sizes = [63, 128], strides = [1, 1]} : vector<64x128xf32> to vector<63x128xf32>
      %19 = tpu.concatenate %17, %18 in 0 : vector<1x128xf32>, vector<63x128xf32> -> vector<64x128xf32>
      %20 = vector.extract_strided_slice %15 {offsets = [1, 0], sizes = [63, 128], strides = [1, 1]} : vector<64x128xf32> to vector<63x128xf32>
      %21 = tpu.concatenate %20, %17 in 0 : vector<63x128xf32>, vector<1x128xf32> -> vector<64x128xf32>
      %c0_10 = arith.constant 0 : index
      %c0_11 = arith.constant 0 : index
      %c0_12 = arith.constant 0 : index
      %22 = vector.load %arg3[%c0_10, %c0_11, %c0_12] : memref<3x128x128xf32, #tpu.memory_space<vmem>>, vector<1x128x128xf32>
      %23 = vector.shape_cast %22 : vector<1x128x128xf32> to vector<128x128xf32>
      %cst_13 = arith.constant dense<0.000000e+00> : vector<64x128xf32>
      %24 = tpu.matmul %19, %23, %cst_13 {dimension_numbers = #tpu.dot_dimension_numbers<[1], [0], [0], [1], [0, 0, 1, 1], [], []>} : vector<64x128xf32>, vector<128x128xf32>, vector<64x128xf32> -> vector<64x128xf32>
      %c1 = arith.constant 1 : index
      %c0_14 = arith.constant 0 : index
      %c0_15 = arith.constant 0 : index
      %25 = vector.load %arg3[%c1, %c0_14, %c0_15] : memref<3x128x128xf32, #tpu.memory_space<vmem>>, vector<1x128x128xf32>
      %26 = vector.shape_cast %25 : vector<1x128x128xf32> to vector<128x128xf32>
      %cst_16 = arith.constant dense<0.000000e+00> : vector<64x128xf32>
      %27 = tpu.matmul %15, %26, %cst_16 {dimension_numbers = #tpu.dot_dimension_numbers<[1], [0], [0], [1], [0, 0, 1, 1], [], []>} : vector<64x128xf32>, vector<128x128xf32>, vector<64x128xf32> -> vector<64x128xf32>
      %28 = arith.addf %24, %27 : vector<64x128xf32>
      %c2 = arith.constant 2 : index
      %c0_17 = arith.constant 0 : index
      %c0_18 = arith.constant 0 : index
      %29 = vector.load %arg3[%c2, %c0_17, %c0_18] : memref<3x128x128xf32, #tpu.memory_space<vmem>>, vector<1x128x128xf32>
      %30 = vector.shape_cast %29 : vector<1x128x128xf32> to vector<128x128xf32>
      %cst_19 = arith.constant dense<0.000000e+00> : vector<64x128xf32>
      %31 = tpu.matmul %21, %30, %cst_19 {dimension_numbers = #tpu.dot_dimension_numbers<[1], [0], [0], [1], [0, 0, 1, 1], [], []>} : vector<64x128xf32>, vector<128x128xf32>, vector<64x128xf32> -> vector<64x128xf32>
      %32 = arith.addf %28, %31 : vector<64x128xf32>
      %33 = vector.broadcast %16 : vector<1x128xf32> to vector<64x128xf32>
      %34 = arith.addf %32, %33 : vector<64x128xf32>
      %35 = tpu.iota {dimensions = array<i32: 1>} : vector<2x32x1xi32>
      %36 = tpu.iota {dimensions = array<i32: 0>} : vector<2x32x1xi32>
      %c2_i32_20 = arith.constant 2 : i32
      %37 = arith.muli %arg1, %c2_i32_20 : i32
      %c2_i32_21 = arith.constant 2 : i32
      %38 = arith.subi %c2_i32_21, %37 : i32
      %c1_i32_22 = arith.constant 1 : i32
      %39 = vector.broadcast %c1_i32_22 : i32 to vector<2x32x1xi32>
      %40 = arith.cmpi sge, %35, %39 : vector<2x32x1xi32>
      %c16_i32 = arith.constant 16 : i32
      %41 = vector.broadcast %c16_i32 : i32 to vector<2x32x1xi32>
      %42 = arith.cmpi sle, %35, %41 : vector<2x32x1xi32>
      %43 = arith.andi %40, %42 : vector<2x32x1xi1>
      %44 = vector.broadcast %38 : i32 to vector<2x32x1xi32>
      %45 = arith.cmpi slt, %36, %44 : vector<2x32x1xi32>
      %46 = arith.andi %43, %45 : vector<2x32x1xi1>
      %47 = arith.extui %46 : vector<2x32x1xi1> to vector<2x32x1xi32>
      %48 = arith.sitofp %47 : vector<2x32x1xi32> to vector<2x32x1xf32>
      %49 = vector.shape_cast %48 : vector<2x32x1xf32> to vector<64x1xf32>
      %50 = vector.broadcast %49 : vector<64x1xf32> to vector<64x128xf32>
      %51 = arith.mulf %34, %50 : vector<64x128xf32>
      %c0_23 = arith.constant 0 : index
      %c0_24 = arith.constant 0 : index
      %52 = vector.load %arg13[%c0_23, %c0_24] : memref<8x128xf32, #tpu.memory_space<vmem>>, vector<1x128xf32>
      %cst_25 = arith.constant dense<0.000000e+00> : vector<128xf32>
      %53 = vector.multi_reduction <add>, %51, %cst_25 [0] : vector<64x128xf32> to vector<128xf32>
      %54 = vector.shape_cast %53 : vector<128xf32> to vector<1x128xf32>
      %55 = arith.addf %52, %54 : vector<1x128xf32>
      %c0_26 = arith.constant 0 : index
      %c0_27 = arith.constant 0 : index
      %56 = vector.load %arg13[%c0_26, %c0_27] : memref<8x128xf32, #tpu.memory_space<vmem>>, vector<1x128xf32>
      tpu.vector_store %arg13[%c0_26, %c0_27], %55 {strides = array<i32>} : memref<8x128xf32, #tpu.memory_space<vmem>>, vector<1x128xf32>,
      %c1_28 = arith.constant 1 : index
      %c0_29 = arith.constant 0 : index
      %57 = vector.load %arg13[%c1_28, %c0_29] : memref<8x128xf32, #tpu.memory_space<vmem>>, vector<1x128xf32>
      %58 = arith.mulf %51, %34 : vector<64x128xf32>
      %cst_30 = arith.constant dense<0.000000e+00> : vector<128xf32>
      %59 = vector.multi_reduction <add>, %58, %cst_30 [0] : vector<64x128xf32> to vector<128xf32>
      %60 = vector.shape_cast %59 : vector<128xf32> to vector<1x128xf32>
      %61 = arith.addf %57, %60 : vector<1x128xf32>
      %c1_31 = arith.constant 1 : index
      %c0_32 = arith.constant 0 : index
      %62 = vector.load %arg13[%c1_31, %c0_32] : memref<8x128xf32, #tpu.memory_space<vmem>>, vector<1x128xf32>
      tpu.vector_store %arg13[%c1_31, %c0_32], %61 {strides = array<i32>} : memref<8x128xf32, #tpu.memory_space<vmem>>, vector<1x128xf32>,
      %63 = arith.index_cast %arg1 : i32 to index
      %c0_33 = arith.constant 0 : index
      %c0_34 = arith.constant 0 : index
      %64 = vector.load %arg12[%63, %c0_33, %c0_34] : memref<1x64x128xf32, #tpu.memory_space<vmem>>, vector<1x64x128xf32>
      %65 = vector.shape_cast %64 : vector<1x64x128xf32> to vector<64x128xf32>
      %66 = vector.shape_cast %34 : vector<64x128xf32> to vector<1x64x128xf32>
      tpu.vector_store %arg12[%63, %c0_33, %c0_34], %66 {strides = array<i32>} : memref<1x64x128xf32, #tpu.memory_space<vmem>>, vector<1x64x128xf32>,
    } else {
    }
    %c1_i32 = arith.constant 1 : i32
    %8 = arith.cmpi eq, %arg0, %c1_i32 : i32
    %9 = arith.extui %8 : i1 to i32
    %c0_i32_4 = arith.constant 0 : i32
    %10 = arith.cmpi ne, %9, %c0_i32_4 : i32
    scf.if %10 {
      %c0_i32_6 = arith.constant 0 : i32
      %14 = arith.cmpi eq, %arg1, %c0_i32_6 : i32
      %15 = arith.extui %14 : i1 to i32
      %c0_i32_7 = arith.constant 0 : i32
      %16 = arith.cmpi ne, %15, %c0_i32_7 : i32
      scf.if %16 {
        %c0_38 = arith.constant 0 : index
        %c0_39 = arith.constant 0 : index
        %81 = vector.load %arg13[%c0_38, %c0_39] : memref<8x128xf32, #tpu.memory_space<vmem>>, vector<1x128xf32>
        %c1_40 = arith.constant 1 : index
        %c0_41 = arith.constant 0 : index
        %82 = vector.load %arg13[%c1_40, %c0_41] : memref<8x128xf32, #tpu.memory_space<vmem>>, vector<1x128xf32>
        %c0_42 = arith.constant 0 : index
        %c0_43 = arith.constant 0 : index
        %83 = vector.load %arg5[%c0_42, %c0_43] : memref<1x128xf32, #tpu.memory_space<vmem>>, vector<1x128xf32>
        %c0_44 = arith.constant 0 : index
        %c0_45 = arith.constant 0 : index
        %84 = vector.load %arg6[%c0_44, %c0_45] : memref<1x128xf32, #tpu.memory_space<vmem>>, vector<1x128xf32>
        %cst_46 = arith.constant 3.125000e-02 : f32
        %85 = vector.broadcast %cst_46 : f32 to vector<1x128xf32>
        %86 = arith.mulf %81, %85 : vector<1x128xf32>
        %cst_47 = arith.constant 3.125000e-02 : f32
        %87 = vector.broadcast %cst_47 : f32 to vector<1x128xf32>
        %88 = arith.mulf %82, %87 : vector<1x128xf32>
        %89 = arith.mulf %86, %86 : vector<1x128xf32>
        %90 = arith.subf %88, %89 : vector<1x128xf32>
        %cst_48 = arith.constant 0.000000e+00 : f32
        %91 = vector.broadcast %cst_48 : f32 to vector<1x128xf32>
        %92 = arith.maximumf %90, %91 : vector<1x128xf32>
        %cst_49 = arith.constant 9.99999974E-6 : f32
        %93 = vector.broadcast %cst_49 : f32 to vector<1x128xf32>
        %94 = arith.addf %92, %93 : vector<1x128xf32>
        %95 = math.rsqrt %94 : vector<1x128xf32>
        %96 = arith.mulf %83, %95 : vector<1x128xf32>
        %97 = arith.mulf %86, %96 : vector<1x128xf32>
        %98 = arith.subf %84, %97 : vector<1x128xf32>
        %c4_50 = arith.constant 4 : index
        %c0_51 = arith.constant 0 : index
        %99 = vector.load %arg13[%c4_50, %c0_51] : memref<8x128xf32, #tpu.memory_space<vmem>>, vector<1x128xf32>
        tpu.vector_store %arg13[%c4_50, %c0_51], %96 {strides = array<i32>} : memref<8x128xf32, #tpu.memory_space<vmem>>, vector<1x128xf32>,
        %c5_52 = arith.constant 5 : index
        %c0_53 = arith.constant 0 : index
        %100 = vector.load %arg13[%c5_52, %c0_53] : memref<8x128xf32, #tpu.memory_space<vmem>>, vector<1x128xf32>
        tpu.vector_store %arg13[%c5_52, %c0_53], %98 {strides = array<i32>} : memref<8x128xf32, #tpu.memory_space<vmem>>, vector<1x128xf32>,
      } else {
      }
      %17 = tpu.iota {dimensions = array<i32: 1>} : vector<2x32x1xi32>
      %18 = tpu.iota {dimensions = array<i32: 0>} : vector<2x32x1xi32>
      %c2_i32_8 = arith.constant 2 : i32
      %19 = arith.muli %arg1, %c2_i32_8 : i32
      %c2_i32_9 = arith.constant 2 : i32
      %20 = arith.subi %c2_i32_9, %19 : i32
      %c1_i32_10 = arith.constant 1 : i32
      %21 = vector.broadcast %c1_i32_10 : i32 to vector<2x32x1xi32>
      %22 = arith.cmpi sge, %17, %21 : vector<2x32x1xi32>
      %c16_i32 = arith.constant 16 : i32
      %23 = vector.broadcast %c16_i32 : i32 to vector<2x32x1xi32>
      %24 = arith.cmpi sle, %17, %23 : vector<2x32x1xi32>
      %25 = arith.andi %22, %24 : vector<2x32x1xi1>
      %26 = vector.broadcast %20 : i32 to vector<2x32x1xi32>
      %27 = arith.cmpi slt, %18, %26 : vector<2x32x1xi32>
      %28 = arith.andi %25, %27 : vector<2x32x1xi1>
      %29 = arith.extui %28 : vector<2x32x1xi1> to vector<2x32x1xi32>
      %30 = arith.sitofp %29 : vector<2x32x1xi32> to vector<2x32x1xf32>
      %31 = vector.shape_cast %30 : vector<2x32x1xf32> to vector<64x1xf32>
      %32 = arith.index_cast %arg1 : i32 to index
      %c0 = arith.constant 0 : index
      %c0_11 = arith.constant 0 : index
      %33 = vector.load %arg12[%32, %c0, %c0_11] : memref<1x64x128xf32, #tpu.memory_space<vmem>>, vector<1x64x128xf32>
      %34 = vector.shape_cast %33 : vector<1x64x128xf32> to vector<64x128xf32>
      %c4 = arith.constant 4 : index
      %c0_12 = arith.constant 0 : index
      %35 = vector.load %arg13[%c4, %c0_12] : memref<8x128xf32, #tpu.memory_space<vmem>>, vector<1x128xf32>
      %36 = vector.broadcast %35 : vector<1x128xf32> to vector<64x128xf32>
      %37 = arith.mulf %34, %36 : vector<64x128xf32>
      %c5 = arith.constant 5 : index
      %c0_13 = arith.constant 0 : index
      %38 = vector.load %arg13[%c5, %c0_13] : memref<8x128xf32, #tpu.memory_space<vmem>>, vector<1x128xf32>
      %39 = vector.broadcast %38 : vector<1x128xf32> to vector<64x128xf32>
      %40 = arith.addf %37, %39 : vector<64x128xf32>
      %cst = arith.constant 0.000000e+00 : f32
      %41 = vector.broadcast %cst : f32 to vector<64x128xf32>
      %42 = arith.maximumf %40, %41 : vector<64x128xf32>
      %43 = vector.broadcast %31 : vector<64x1xf32> to vector<64x128xf32>
      %44 = arith.mulf %42, %43 : vector<64x128xf32>
      %c0_14 = arith.constant 0 : index
      %c0_15 = arith.constant 0 : index
      %45 = vector.load %arg8[%c0_14, %c0_15] : memref<1x128xf32, #tpu.memory_space<vmem>>, vector<1x128xf32>
      %cst_16 = arith.constant 0.000000e+00 : f32
      %46 = vector.broadcast %cst_16 : f32 to vector<1x128xf32>
      %47 = vector.extract_strided_slice %44 {offsets = [0, 0], sizes = [63, 128], strides = [1, 1]} : vector<64x128xf32> to vector<63x128xf32>
      %48 = tpu.concatenate %46, %47 in 0 : vector<1x128xf32>, vector<63x128xf32> -> vector<64x128xf32>
      %49 = vector.extract_strided_slice %44 {offsets = [1, 0], sizes = [63, 128], strides = [1, 1]} : vector<64x128xf32> to vector<63x128xf32>
      %50 = tpu.concatenate %49, %46 in 0 : vector<63x128xf32>, vector<1x128xf32> -> vector<64x128xf32>
      %c0_17 = arith.constant 0 : index
      %c0_18 = arith.constant 0 : index
      %c0_19 = arith.constant 0 : index
      %51 = vector.load %arg7[%c0_17, %c0_18, %c0_19] : memref<3x128x128xf32, #tpu.memory_space<vmem>>, vector<1x128x128xf32>
      %52 = vector.shape_cast %51 : vector<1x128x128xf32> to vector<128x128xf32>
      %cst_20 = arith.constant dense<0.000000e+00> : vector<64x128xf32>
      %53 = tpu.matmul %48, %52, %cst_20 {dimension_numbers = #tpu.dot_dimension_numbers<[1], [0], [0], [1], [0, 0, 1, 1], [], []>} : vector<64x128xf32>, vector<128x128xf32>, vector<64x128xf32> -> vector<64x128xf32>
      %c1 = arith.constant 1 : index
      %c0_21 = arith.constant 0 : index
      %c0_22 = arith.constant 0 : index
      %54 = vector.load %arg7[%c1, %c0_21, %c0_22] : memref<3x128x128xf32, #tpu.memory_space<vmem>>, vector<1x128x128xf32>
      %55 = vector.shape_cast %54 : vector<1x128x128xf32> to vector<128x128xf32>
      %cst_23 = arith.constant dense<0.000000e+00> : vector<64x128xf32>
      %56 = tpu.matmul %44, %55, %cst_23 {dimension_numbers = #tpu.dot_dimension_numbers<[1], [0], [0], [1], [0, 0, 1, 1], [], []>} : vector<64x128xf32>, vector<128x128xf32>, vector<64x128xf32> -> vector<64x128xf32>
      %57 = arith.addf %53, %56 : vector<64x128xf32>
      %c2 = arith.constant 2 : index
      %c0_24 = arith.constant 0 : index
      %c0_25 = arith.constant 0 : index
      %58 = vector.load %arg7[%c2, %c0_24, %c0_25] : memref<3x128x128xf32, #tpu.memory_space<vmem>>, vector<1x128x128xf32>
      %59 = vector.shape_cast %58 : vector<1x128x128xf32> to vector<128x128xf32>
      %cst_26 = arith.constant dense<0.000000e+00> : vector<64x128xf32>
      %60 = tpu.matmul %50, %59, %cst_26 {dimension_numbers = #tpu.dot_dimension_numbers<[1], [0], [0], [1], [0, 0, 1, 1], [], []>} : vector<64x128xf32>, vector<128x128xf32>, vector<64x128xf32> -> vector<64x128xf32>
      %61 = arith.addf %57, %60 : vector<64x128xf32>
      %62 = vector.broadcast %45 : vector<1x128xf32> to vector<64x128xf32>
      %63 = arith.addf %61, %62 : vector<64x128xf32>
      %64 = vector.broadcast %31 : vector<64x1xf32> to vector<64x128xf32>
      %65 = arith.mulf %63, %64 : vector<64x128xf32>
      %c2_27 = arith.constant 2 : index
      %c0_28 = arith.constant 0 : index
      %66 = vector.load %arg13[%c2_27, %c0_28] : memref<8x128xf32, #tpu.memory_space<vmem>>, vector<1x128xf32>
      %cst_29 = arith.constant dense<0.000000e+00> : vector<128xf32>
      %67 = vector.multi_reduction <add>, %65, %cst_29 [0] : vector<64x128xf32> to vector<128xf32>
      %68 = vector.shape_cast %67 : vector<128xf32> to vector<1x128xf32>
      %69 = arith.addf %66, %68 : vector<1x128xf32>
      %c2_30 = arith.constant 2 : index
      %c0_31 = arith.constant 0 : index
      %70 = vector.load %arg13[%c2_30, %c0_31] : memref<8x128xf32, #tpu.memory_space<vmem>>, vector<1x128xf32>
      tpu.vector_store %arg13[%c2_30, %c0_31], %69 {strides = array<i32>} : memref<8x128xf32, #tpu.memory_space<vmem>>, vector<1x128xf32>,
      %c3 = arith.constant 3 : index
      %c0_32 = arith.constant 0 : index
      %71 = vector.load %arg13[%c3, %c0_32] : memref<8x128xf32, #tpu.memory_space<vmem>>, vector<1x128xf32>
      %72 = arith.mulf %65, %63 : vector<64x128xf32>
      %cst_33 = arith.constant dense<0.000000e+00> : vector<128xf32>
      %73 = vector.multi_reduction <add>, %72, %cst_33 [0] : vector<64x128xf32> to vector<128xf32>
      %74 = vector.shape_cast %73 : vector<128xf32> to vector<1x128xf32>
      %75 = arith.addf %71, %74 : vector<1x128xf32>
      %c3_34 = arith.constant 3 : index
      %c0_35 = arith.constant 0 : index
      %76 = vector.load %arg13[%c3_34, %c0_35] : memref<8x128xf32, #tpu.memory_space<vmem>>, vector<1x128xf32>
      tpu.vector_store %arg13[%c3_34, %c0_35], %75 {strides = array<i32>} : memref<8x128xf32, #tpu.memory_space<vmem>>, vector<1x128xf32>,
      %77 = arith.index_cast %arg1 : i32 to index
      %c0_36 = arith.constant 0 : index
      %c0_37 = arith.constant 0 : index
      %78 = vector.load %arg12[%77, %c0_36, %c0_37] : memref<1x64x128xf32, #tpu.memory_space<vmem>>, vector<1x64x128xf32>
      %79 = vector.shape_cast %78 : vector<1x64x128xf32> to vector<64x128xf32>
      %80 = vector.shape_cast %63 : vector<64x128xf32> to vector<1x64x128xf32>
      tpu.vector_store %arg12[%77, %c0_36, %c0_37], %80 {strides = array<i32>} : memref<1x64x128xf32, #tpu.memory_space<vmem>>, vector<1x64x128xf32>,
    } else {
    }
    %c2_i32 = arith.constant 2 : i32
    %11 = arith.cmpi eq, %arg0, %c2_i32 : i32
    %12 = arith.extui %11 : i1 to i32
    %c0_i32_5 = arith.constant 0 : i32
    %13 = arith.cmpi ne, %12, %c0_i32_5 : i32
    scf.if %13 {
      %c0_i32_6 = arith.constant 0 : i32
      %14 = arith.cmpi eq, %arg1, %c0_i32_6 : i32
      %15 = arith.extui %14 : i1 to i32
      %c0_i32_7 = arith.constant 0 : i32
      %16 = arith.cmpi ne, %15, %c0_i32_7 : i32
      scf.if %16 {
        %c2 = arith.constant 2 : index
        %c0_16 = arith.constant 0 : index
        %36 = vector.load %arg13[%c2, %c0_16] : memref<8x128xf32, #tpu.memory_space<vmem>>, vector<1x128xf32>
        %c3 = arith.constant 3 : index
        %c0_17 = arith.constant 0 : index
        %37 = vector.load %arg13[%c3, %c0_17] : memref<8x128xf32, #tpu.memory_space<vmem>>, vector<1x128xf32>
        %c0_18 = arith.constant 0 : index
        %c0_19 = arith.constant 0 : index
        %38 = vector.load %arg9[%c0_18, %c0_19] : memref<1x128xf32, #tpu.memory_space<vmem>>, vector<1x128xf32>
        %c0_20 = arith.constant 0 : index
        %c0_21 = arith.constant 0 : index
        %39 = vector.load %arg10[%c0_20, %c0_21] : memref<1x128xf32, #tpu.memory_space<vmem>>, vector<1x128xf32>
        %cst_22 = arith.constant 3.125000e-02 : f32
        %40 = vector.broadcast %cst_22 : f32 to vector<1x128xf32>
        %41 = arith.mulf %36, %40 : vector<1x128xf32>
        %cst_23 = arith.constant 3.125000e-02 : f32
        %42 = vector.broadcast %cst_23 : f32 to vector<1x128xf32>
        %43 = arith.mulf %37, %42 : vector<1x128xf32>
        %44 = arith.mulf %41, %41 : vector<1x128xf32>
        %45 = arith.subf %43, %44 : vector<1x128xf32>
        %cst_24 = arith.constant 0.000000e+00 : f32
        %46 = vector.broadcast %cst_24 : f32 to vector<1x128xf32>
        %47 = arith.maximumf %45, %46 : vector<1x128xf32>
        %cst_25 = arith.constant 9.99999974E-6 : f32
        %48 = vector.broadcast %cst_25 : f32 to vector<1x128xf32>
        %49 = arith.addf %47, %48 : vector<1x128xf32>
        %50 = math.rsqrt %49 : vector<1x128xf32>
        %51 = arith.mulf %38, %50 : vector<1x128xf32>
        %52 = arith.mulf %41, %51 : vector<1x128xf32>
        %53 = arith.subf %39, %52 : vector<1x128xf32>
        %c6_26 = arith.constant 6 : index
        %c0_27 = arith.constant 0 : index
        %54 = vector.load %arg13[%c6_26, %c0_27] : memref<8x128xf32, #tpu.memory_space<vmem>>, vector<1x128xf32>
        tpu.vector_store %arg13[%c6_26, %c0_27], %51 {strides = array<i32>} : memref<8x128xf32, #tpu.memory_space<vmem>>, vector<1x128xf32>,
        %c7_28 = arith.constant 7 : index
        %c0_29 = arith.constant 0 : index
        %55 = vector.load %arg13[%c7_28, %c0_29] : memref<8x128xf32, #tpu.memory_space<vmem>>, vector<1x128xf32>
        tpu.vector_store %arg13[%c7_28, %c0_29], %53 {strides = array<i32>} : memref<8x128xf32, #tpu.memory_space<vmem>>, vector<1x128xf32>,
      } else {
      }
      %17 = arith.index_cast %arg1 : i32 to index
      %c0 = arith.constant 0 : index
      %c0_8 = arith.constant 0 : index
      %18 = vector.load %arg12[%17, %c0, %c0_8] : memref<1x64x128xf32, #tpu.memory_space<vmem>>, vector<1x64x128xf32>
      %19 = vector.shape_cast %18 : vector<1x64x128xf32> to vector<64x128xf32>
      %c6 = arith.constant 6 : index
      %c0_9 = arith.constant 0 : index
      %20 = vector.load %arg13[%c6, %c0_9] : memref<8x128xf32, #tpu.memory_space<vmem>>, vector<1x128xf32>
      %21 = vector.broadcast %20 : vector<1x128xf32> to vector<64x128xf32>
      %22 = arith.mulf %19, %21 : vector<64x128xf32>
      %c7 = arith.constant 7 : index
      %c0_10 = arith.constant 0 : index
      %23 = vector.load %arg13[%c7, %c0_10] : memref<8x128xf32, #tpu.memory_space<vmem>>, vector<1x128xf32>
      %24 = vector.broadcast %23 : vector<1x128xf32> to vector<64x128xf32>
      %25 = arith.addf %22, %24 : vector<64x128xf32>
      %cst = arith.constant 0.000000e+00 : f32
      %26 = vector.broadcast %cst : f32 to vector<64x128xf32>
      %27 = arith.maximumf %25, %26 : vector<64x128xf32>
      %28 = vector.extract_strided_slice %27 {offsets = [1, 0], sizes = [16, 128], strides = [1, 1]} : vector<64x128xf32> to vector<16x128xf32>
      %c0_11 = arith.constant 0 : index
      %c0_12 = arith.constant 0 : index
      %c0_13 = arith.constant 0 : index
      %29 = vector.load %arg11[%c0_11, %c0_12, %c0_13] : memref<2x16x128xf32, #tpu.memory_space<vmem>>, vector<1x16x128xf32>
      %30 = vector.shape_cast %29 : vector<1x16x128xf32> to vector<16x128xf32>
      %31 = vector.shape_cast %28 : vector<16x128xf32> to vector<1x16x128xf32>
      tpu.vector_store %arg11[%c0_11, %c0_12, %c0_13], %31 {strides = array<i32>} : memref<2x16x128xf32, #tpu.memory_space<vmem>>, vector<1x16x128xf32>,
      %32 = vector.extract_strided_slice %27 {offsets = [33, 0], sizes = [16, 128], strides = [1, 1]} : vector<64x128xf32> to vector<16x128xf32>
      %c1 = arith.constant 1 : index
      %c0_14 = arith.constant 0 : index
      %c0_15 = arith.constant 0 : index
      %33 = vector.load %arg11[%c1, %c0_14, %c0_15] : memref<2x16x128xf32, #tpu.memory_space<vmem>>, vector<1x16x128xf32>
      %34 = vector.shape_cast %33 : vector<1x16x128xf32> to vector<16x128xf32>
      %35 = vector.shape_cast %32 : vector<16x128xf32> to vector<1x16x128xf32>
      tpu.vector_store %arg11[%c1, %c0_14, %c0_15], %35 {strides = array<i32>} : memref<2x16x128xf32, #tpu.memory_space<vmem>>, vector<1x16x128xf32>,
    } else {
    }
    return
  }
  func.func @transform_0(%arg0: i32, %arg1: i32) -> (i32, i32, i32) {
    %c0_i32 = arith.constant 0 : i32
    %0 = arith.cmpi eq, %arg0, %c0_i32 : i32
    %c0_i32_0 = arith.constant 0 : i32
    %1 = arith.select %0, %arg1, %c0_i32_0 : i32
    %c0_i32_1 = arith.constant 0 : i32
    %c0_i32_2 = arith.constant 0 : i32
    %c0_i32_3 = arith.constant 0 : i32
    return %1, %c0_i32_1, %c0_i32_2 : i32, i32, i32
  }
  func.func @transform_1(%arg0: i32, %arg1: i32) -> (i32, i32, i32) {
    %c0_i32 = arith.constant 0 : i32
    %c0_i32_0 = arith.constant 0 : i32
    %c0_i32_1 = arith.constant 0 : i32
    %c0_i32_2 = arith.constant 0 : i32
    return %c0_i32, %c0_i32_0, %c0_i32_1 : i32, i32, i32
  }
  func.func @transform_2(%arg0: i32, %arg1: i32) -> (i32, i32) {
    %c0_i32 = arith.constant 0 : i32
    %c0_i32_0 = arith.constant 0 : i32
    %c0_i32_1 = arith.constant 0 : i32
    return %c0_i32, %c0_i32_0 : i32, i32
  }
  func.func @transform_3(%arg0: i32, %arg1: i32) -> (i32, i32) {
    %c0_i32 = arith.constant 0 : i32
    %c0_i32_0 = arith.constant 0 : i32
    %c0_i32_1 = arith.constant 0 : i32
    return %c0_i32, %c0_i32_0 : i32, i32
  }
  func.func @transform_4(%arg0: i32, %arg1: i32) -> (i32, i32) {
    %c0_i32 = arith.constant 0 : i32
    %c0_i32_0 = arith.constant 0 : i32
    %c0_i32_1 = arith.constant 0 : i32
    return %c0_i32, %c0_i32_0 : i32, i32
  }
  func.func @transform_5(%arg0: i32, %arg1: i32) -> (i32, i32, i32) {
    %c0_i32 = arith.constant 0 : i32
    %c0_i32_0 = arith.constant 0 : i32
    %c0_i32_1 = arith.constant 0 : i32
    %c0_i32_2 = arith.constant 0 : i32
    return %c0_i32, %c0_i32_0, %c0_i32_1 : i32, i32, i32
  }
  func.func @transform_6(%arg0: i32, %arg1: i32) -> (i32, i32) {
    %c0_i32 = arith.constant 0 : i32
    %c0_i32_0 = arith.constant 0 : i32
    %c0_i32_1 = arith.constant 0 : i32
    return %c0_i32, %c0_i32_0 : i32, i32
  }
  func.func @transform_7(%arg0: i32, %arg1: i32) -> (i32, i32) {
    %c0_i32 = arith.constant 0 : i32
    %c0_i32_0 = arith.constant 0 : i32
    %c0_i32_1 = arith.constant 0 : i32
    return %c0_i32, %c0_i32_0 : i32, i32
  }
  func.func @transform_8(%arg0: i32, %arg1: i32) -> (i32, i32) {
    %c0_i32 = arith.constant 0 : i32
    %c0_i32_0 = arith.constant 0 : i32
    %c0_i32_1 = arith.constant 0 : i32
    return %c0_i32, %c0_i32_0 : i32, i32
  }
  func.func @transform_9(%arg0: i32, %arg1: i32) -> (i32, i32, i32) {
    %c2_i32 = arith.constant 2 : i32
    %0 = arith.cmpi eq, %arg0, %c2_i32 : i32
    %c0_i32 = arith.constant 0 : i32
    %1 = arith.select %0, %arg1, %c0_i32 : i32
    %c0_i32_0 = arith.constant 0 : i32
    %c0_i32_1 = arith.constant 0 : i32
    %c0_i32_2 = arith.constant 0 : i32
    return %1, %c0_i32_0, %c0_i32_1 : i32, i32, i32
  }
}

</mosaic_0001>

<bundles_post_ra>
// kernel: conv_block.1
= control target key start
LH: loop header
LB: loop body
LE: loop exit
PB: predicated region body
PF: predicated region fallthrough
CT: control target
= control target key end

     0   :  { %s2390_s30 = smov 0   ;;  %s2392_s10 = smov 0   ;;  %s2919_s0 = inlined_call_operand.vmem [shape: f32[1,64,128], index: 0, kind: input, shape index: {}]   ;;  %s2920_s1 = inlined_call_operand.vmem [shape: f32[3,128,128], index: 1, kind: input, shape index: {}]   ;;  %s2921_s2 = inlined_call_operand.vmem [shape: f32[1,128], index: 2, kind: input, shape index: {}]   ;;  %s2922_s3 = inlined_call_operand.vmem [shape: f32[1,128], index: 3, kind: input, shape index: {}]   ;;  %s2923_s4 = inlined_call_operand.vmem [shape: f32[1,128], index: 4, kind: input, shape index: {}]   ;;  %s2924_s5 = inlined_call_operand.vmem [shape: f32[3,128,128], index: 5, kind: input, shape index: {}]   ;;  %s2925_s6 = inlined_call_operand.vmem [shape: f32[1,128], index: 6, kind: input, shape index: {}]   ;;  %s2926_s7 = inlined_call_operand.vmem [shape: f32[1,128], index: 7, kind: input, shape index: {}]   ;;  %s2927_s8 = inlined_call_operand.vmem [shape: f32[1,128], index: 8, kind: input, shape index: {}]   ;;  %s2928_s9 = inlined_call_operand.vmem [shape: f32[2,16,128], index: 9, kind: output, shape index: {}]  }
   0x1   :  { %s2394_s11 = smov 0  }
   0x2 LB: > { %s31_s12 = sadd.s32 1, %s2331_s10  ;;  %p1713_p0 = scmp.ge.s32.totalorder %s2335_s11, 1  ;;  %s2335_s11 = sphi %s2394_s11, %s19_s11   ;;  %s2331_s10 = sphi %s2392_s10, %s2930_s10   ;;  %s2327_s30 = sphi %s2390_s30, %s2929_s30  }
   0x3   : > { %p33_p1 = scmp.ge.s32.totalorder %s31_s12, 3  ;;  %p311_p2 = scmp.lt.s32.totalorder %s2335_s11, 4 }
   0x5   : > { %s2932_s12 = smov (%p33_p1, %s31_s12), 0  ;;  %p312_p3 = pnand %p1713_p0, %p311_p2 }
   0x6   : > { %p372_p4 = scmp.eq.s32.totalorder (!%p312_p3), %s2327_s30, 0 }
   0x7   : > { %315 = sbr.rel (%p312_p3) target bundleno = 715 (0x2cb), region = 56 }
   0xc   : > { %377 = sbr.rel (!%p372_p4) target bundleno = 17 (0x11), region = 60  ;;  %v2337_v0 = vmov (%p372_p4), 0.0  }
   0xd   : > { %378 = vst [vmem:[#allocation3] sm:$0xff] (%p372_p4), %v2337_v0 }
  0x11 PF: > { %p1715_p5 = scmp.ne.s32.totalorder %s2327_s30, 0 }
  0x13   : > { %381 = sbr.rel (%p1715_p5) target bundleno = 332 (0x14c), region = 64 }
  0x18   : > { %v1731_v1 = vld [vmem:[%s2920_s1 + $0xf8] sm:$0xff]  ;;  %v1730_v3 = vld [vmem:[%s2920_s1 + $0xf0] sm:$0xff]  ;;  %v1729_v5 = vld [vmem:[%s2920_s1 + $0xe8] sm:$0xff]  ;;  %vm399_vm0 = vcmask 1040384   ;;  %vm424_vm2 = vcmask 1046528  }
  0x19   : > { %v464_v2 = vld [vmem:[%s2920_s1 + $0x78] sm:$0xff]  ;;  %1954 = vmatprep.subr.mxu0 %v1731_v1  ;;  %v463_v4 = vld [vmem:[%s2920_s1 + $0x70] sm:$0xff]  ;;  %v462_v6 = vld [vmem:[%s2920_s1 + $0x68] sm:$0xff] }
  0x1a   : > { %1998 = vmatprep.subr.mxu1 %v464_v2  ;;  %1955 = vmatpush3.msra.mxu0 %v1731_v1  ;;  %v1728_v7 = vld [vmem:[%s2920_s1 + $0xe0] sm:$0xff]  ;;  %v1727_v9 = vld [vmem:[%s2920_s1 + $0xd8] sm:$0xff]  ;;  %v1726_v11 = vld [vmem:[%s2920_s1 + $0xd0] sm:$0xff] }
  0x1b   : > { %1999 = vmatpush3.msra.mxu1 %v464_v2  ;;  %1956 = vmatprep.subr.mxu0 %v1730_v3  ;;  %v461_v8 = vld [vmem:[%s2920_s1 + $0x60] sm:$0xff]  ;;  %v460_v10 = vld [vmem:[%s2920_s1 + $0x58] sm:$0xff]  ;;  %v459_v12 = vld [vmem:[%s2920_s1 + $0x50] sm:$0xff] }
  0x1c   : > { %2000 = vmatprep.subr.mxu1 %v463_v4  ;;  %1957 = vmatpush3.msra.mxu0 %v1730_v3  ;;  %v1725_v13 = vld [vmem:[%s2920_s1 + $0xc8] sm:$0xff]  ;;  %v1724_v15 = vld [vmem:[%s2920_s1 + $0xc0] sm:$0xff]  ;;  %v1723_v17 = vld [vmem:[%s2920_s1 + $0xb8] sm:$0xff] }
  0x1d   : > { %2001 = vmatpush3.msra.mxu1 %v463_v4  ;;  %1958 = vmatprep.subr.mxu0 %v1729_v5  ;;  %v458_v14 = vld [vmem:[%s2920_s1 + $0x48] sm:$0xff]  ;;  %v457_v16 = vld [vmem:[%s2920_s1 + $0x40] sm:$0xff]  ;;  %v456_v18 = vld [vmem:[%s2920_s1 + $0x38] sm:$0xff] }
  0x1e   : > { %2002 = vmatprep.subr.mxu1 %v462_v6  ;;  %1959 = vmatpush3.msra.mxu0 %v1729_v5  ;;  %v1722_v19 = vld [vmem:[%s2920_s1 + $0xb0] sm:$0xff]  ;;  %v1721_v21 = vld [vmem:[%s2920_s1 + $0xa8] sm:$0xff]  ;;  %v1720_v23 = vld [vmem:[%s2920_s1 + $0xa0] sm:$0xff] }
  0x1f   : > { %2003 = vmatpush3.msra.mxu1 %v462_v6  ;;  %1960 = vmatprep.subr.mxu0 %v1728_v7  ;;  %v455_v20 = vld [vmem:[%s2920_s1 + $0x30] sm:$0xff]  ;;  %v454_v22 = vld [vmem:[%s2920_s1 + $0x28] sm:$0xff]  ;;  %v453_v24 = vld [vmem:[%s2920_s1 + $0x20] sm:$0xff] }
  0x20   : > { %2004 = vmatprep.subr.mxu1 %v461_v8  ;;  %1961 = vmatpush3.msra.mxu0 %v1728_v7  ;;  %v1719_v25 = vld [vmem:[%s2920_s1 + $0x98] sm:$0xff]  ;;  %v1718_v27 = vld [vmem:[%s2920_s1 + $0x90] sm:$0xff]  ;;  %v2499_v29 = vld [vmem:[%s2919_s0] sm:$0xff] }
  0x21   : > { %2005 = vmatpush3.msra.mxu1 %v461_v8  ;;  %1962 = vmatprep.subr.mxu0 %v1727_v9  ;;  %v452_v26 = vld [vmem:[%s2920_s1 + $0x18] sm:$0xff]  ;;  %v451_v28 = vld [vmem:[%s2920_s1 + $0x10] sm:$0xff]  ;;  %v2504_v30 = vld [vmem:[%s2919_s0 + $0x8] sm:$0xff]  ;;  %v400_v33 = vrot.slane %v2499_v29, 7  ;;  %v425_v6 = vrot.slane %v2499_v29, 1 }
  0x22   : > { %2006 = vmatprep.subr.mxu1 %v460_v10  ;;  %1963 = vmatpush3.msra.mxu0 %v1727_v9  ;;  %v1717_v31 = vld [vmem:[%s2920_s1 + $0x88] sm:$0xff]  ;;  %v401_v34 = vrot.slane %v2504_v30, 7  ;;  %v1716_v35 = vld [vmem:[%s2920_s1 + $0x80] sm:$0xff]  ;;  %vm1732_vm1 = vmneg %vm399_vm0  ;;  %v426_v7 = vrot.slane %v2504_v30, 1 }
  0x23   : > { %2007 = vmatpush3.msra.mxu1 %v460_v10  ;;  %1964 = vmatprep.subr.mxu0 %v1726_v11  ;;  %v450_v32 = vld [vmem:[%s2920_s1 + $0x8] sm:$0xff]  ;;  %v449_v36 = vld [vmem:[%s2920_s1] sm:$0xff]  ;;  %v1749_v38 = vld [vmem:[%s2920_s1 + $0x178] sm:$0xff] }
  0x24   : > { %2008 = vmatprep.subr.mxu1 %v459_v12  ;;  %1965 = vmatpush3.msra.mxu0 %v1726_v11  ;;  %v402_v37 = vsel %vm399_vm0, %v400_v33, %v401_v34  ;;  %v1748_v39 = vld [vmem:[%s2920_s1 + $0x170] sm:$0xff]  ;;  %v1747_v40 = vld [vmem:[%s2920_s1 + $0x168] sm:$0xff]  ;;  %v1746_v41 = vld [vmem:[%s2920_s1 + $0x160] sm:$0xff] }
  0x25   : > { %2009 = vmatpush3.msra.mxu1 %v459_v12  ;;  %1966 = vmatprep.subr.mxu0 %v1725_v13  ;;  %v1745_v42 = vld [vmem:[%s2920_s1 + $0x158] sm:$0xff]  ;;  %v1744_v43 = vld [vmem:[%s2920_s1 + $0x150] sm:$0xff]  ;;  %v1743_v45 = vld [vmem:[%s2920_s1 + $0x148] sm:$0xff] }
  0x26   : > { %2010 = vmatprep.subr.mxu1 %v458_v14  ;;  %1967 = vmatpush3.msra.mxu0 %v1725_v13  ;;  %v2547_v44 = vld [vmem:[%s2919_s0 + $0x10] sm:$0xff]  ;;  %v2555_v46 = vld [vmem:[%s2919_s0 + $0x18] sm:$0xff]  ;;  %v1742_v48 = vld [vmem:[%s2920_s1 + $0x140] sm:$0xff] }
  0x27   : > { %2011 = vmatpush3.msra.mxu1 %v458_v14  ;;  %1968 = vmatprep.subr.mxu0 %v1724_v15  ;;  %v403_v47 = vrot.slane %v2547_v44, 7  ;;  %v405_v49 = vrot.slane %v2555_v46, 7  ;;  %v1741_v50 = vld [vmem:[%s2920_s1 + $0x138] sm:$0xff]  ;;  %v2568_v51 = vld [vmem:[%s2919_s0 + $0x20] sm:$0xff]  ;;  %v2576_v53 = vld [vmem:[%s2919_s0 + $0x28] sm:$0xff]  ;;  %v428_v11 = vrot.slane %v2547_v44, 1 }
  0x28   : > { %2012 = vmatprep.subr.mxu1 %v457_v16  ;;  %1969 = vmatpush3.msra.mxu0 %v1724_v15  ;;  %v407_v55 = vrot.slane %v2568_v51, 7  ;;  %v1740_v56 = vld [vmem:[%s2920_s1 + $0x130] sm:$0xff]  ;;  %v409_v57 = vrot.slane %v2576_v53, 7  ;;  %v1739_v58 = vld [vmem:[%s2920_s1 + $0x128] sm:$0xff]  ;;  %v2598_v61 = vld [vmem:[%s2919_s0 + $0x38] sm:$0xff]  ;;  %v432_v8 = vrot.slane %v2568_v51, 1 }
  0x29   : > { %2013 = vmatpush3.msra.mxu1 %v457_v16  ;;  %1970 = vmatprep.subr.mxu0 %v1723_v17  ;;  %v404_v52 = vsel %vm399_vm0, %v401_v34, %v403_v47  ;;  %v406_v54 = vsel %vm399_vm0, %v403_v47, %v405_v49  ;;  %v2592_v59 = vld [vmem:[%s2919_s0 + $0x30] sm:$0xff]  ;;  %v1738_v0 = vld [vmem:[%s2920_s1 + $0x120] sm:$0xff]  ;;  %v413_v1 = vrot.slane %v2598_v61, 7  ;;  %v1737_v2 = vld [vmem:[%s2920_s1 + $0x118] sm:$0xff]  ;;  %v434_v9 = vrot.slane %v2576_v53, 1 }
  0x2a   : > { %2014 = vmatprep.subr.mxu1 %v456_v18  ;;  %1971 = vmatpush3.msra.mxu0 %v1723_v17  ;;  %v408_v60 = vsel %vm399_vm0, %v405_v49, %v407_v55  ;;  %v410_v62 = vsel %vm399_vm0, %v407_v55, %v409_v57  ;;  %v411_v63 = vrot.slane %v2592_v59, 7  ;;  %v1736_v5 = vld [vmem:[%s2920_s1 + $0x110] sm:$0xff]  ;;  %v1735_v10 = vld [vmem:[%s2920_s1 + $0x108] sm:$0xff]  ;;  %v436_v12 = vrot.slane %v2592_v59, 1  ;;  %v1734_v15 = vld [vmem:[%s2920_s1 + $0x100] sm:$0xff] }
  0x2b   : > { %2015 = vmatpush3.msra.mxu1 %v456_v18  ;;  %1972 = vmatprep.subr.mxu0 %v1722_v19  ;;  %v430_v13 = vrot.slane %v2555_v46, 1  ;;  %v438_v14 = vrot.slane %v2598_v61, 1  ;;  %v427_v16 = vsel %vm424_vm2, %v425_v6, %v426_v7  ;;  %v435_v17 = vsel %vm424_vm2, %v432_v8, %v434_v9 }
  0x2c   : > { %2016 = vmatprep.subr.mxu1 %v455_v20  ;;  %1973 = vmatpush3.msra.mxu0 %v1722_v19  ;;  %v412_v3 = vsel %vm399_vm0, %v409_v57, %v411_v63  ;;  %v414_v4 = vsel %vm399_vm0, %v411_v63, %v413_v1  ;;  %v429_v18 = vsel %vm424_vm2, %v426_v7, %v428_v11 }
  0x2d   : > { %2017 = vmatpush3.msra.mxu1 %v455_v20  ;;  %1974 = vmatprep.subr.mxu0 %v1721_v21  ;;  %v437_v19 = vsel %vm424_vm2, %v434_v9, %v436_v12  ;;  %v431_v20 = vsel %vm424_vm2, %v428_v11, %v430_v13 }
  0x2e   : > { %2018 = vmatprep.subr.mxu1 %v454_v22  ;;  %1975 = vmatpush3.msra.mxu0 %v1721_v21  ;;  %v439_v21 = vsel %vm424_vm2, %v436_v12, %v438_v14 }
  0x2f   : > { %2019 = vmatpush3.msra.mxu1 %v454_v22  ;;  %1976 = vmatprep.subr.mxu0 %v1720_v23  ;;  %v433_v22 = vsel %vm424_vm2, %v430_v13, %v432_v8 }
  0x30   : > { %2020 = vmatprep.subr.mxu1 %v453_v24  ;;  %1977 = vmatpush3.msra.mxu0 %v1720_v23 }
  0x31   : > { %2021 = vmatpush3.msra.mxu1 %v453_v24  ;;  %1978 = vmatprep.subr.mxu0 %v1719_v25 }
  0x32   : > { %2022 = vmatprep.subr.mxu1 %v452_v26  ;;  %1979 = vmatpush3.msra.mxu0 %v1719_v25 }
  0x33   : > { %2023 = vmatpush3.msra.mxu1 %v452_v26  ;;  %1980 = vmatprep.subr.mxu0 %v1718_v27 }
  0x34   : > { %2024 = vmatprep.subr.mxu1 %v451_v28  ;;  %1981 = vmatpush3.msra.mxu0 %v1718_v27 }
  0x35   : > { %2025 = vmatpush3.msra.mxu1 %v451_v28  ;;  %1982 = vmatprep.subr.mxu0 %v1717_v31 }
  0x36   : > { %2026 = vmatprep.subr.mxu1 %v450_v32  ;;  %1983 = vmatpush3.msra.mxu0 %v1717_v31 }
  0x37   : > { %2027 = vmatpush3.msra.mxu1 %v450_v32  ;;  %1984 = vmatprep.subr.mxu0 %v1716_v35 }
  0x38   : > { %2028 = vmatprep.subr.mxu1 %v449_v36  ;;  %1985 = vmatpush3.msra.mxu0 %v1716_v35  ;;  %v836_v35 = vlaneseq }
  0x39   : > { %1986 = vmatprep.mubr.f32.mxu0 %v2499_v29  ;;  %2029 = vmatpush3.msra.mxu1 %v449_v36 }
  0x3a   : > { %2030 = vmatprep.mubr.msk.f32.mxu1 %vm1732_vm1, %v400_v33  ;;  %1987 = vmatmul.mubr.f32.vlgmr.msra.gmra.mxu0 %v2504_v30 }
  0x3b   : > { %2031 = vmatmul.mubr.f32.vlgmr.msra.gmra.mxu1 %v402_v37  ;;  %2042 = vmatprep.subr.mxu0 %v1749_v38 }
  0x3c   : > { %2218 = vmatprep.subr.mxu1 %v1749_v38  ;;  %2043 = vmatpush3.msra.mxu0 %v1749_v38 }
  0x3d   : > { %2234 = vmatpush3.msra.mxu1 %v1749_v38  ;;  %2044 = vmatprep.subr.mxu0 %v1748_v39  ;;  %v837_v38 = vshrl.u32 %v836_v35, 7 }
  0x3e   : > { %2219 = vmatprep.subr.mxu1 %v1748_v39  ;;  %2045 = vmatpush3.msra.mxu0 %v1748_v39 }
  0x3f   : > { %2235 = vmatpush3.msra.mxu1 %v1748_v39  ;;  %2046 = vmatprep.subr.mxu0 %v1747_v40  ;;  %vm843_vm3 = vcmp.ge.s32.totalorder %v837_v38, 1 }
  0x40   : > { %2220 = vmatprep.subr.mxu1 %v1747_v40  ;;  %2047 = vmatpush3.msra.mxu0 %v1747_v40 }
  0x41   : > { %2236 = vmatpush3.msra.mxu1 %v1747_v40  ;;  %2048 = vmatprep.subr.mxu0 %v1746_v41 }
  0x42   : > { %2221 = vmatprep.subr.mxu1 %v1746_v41  ;;  %2049 = vmatpush3.msra.mxu0 %v1746_v41 }
  0x43   : > { %2237 = vmatpush3.msra.mxu1 %v1746_v41  ;;  %2050 = vmatprep.subr.mxu0 %v1745_v42 }
  0x44   : > { %2222 = vmatprep.subr.mxu1 %v1745_v42  ;;  %2051 = vmatpush3.msra.mxu0 %v1745_v42 }
  0x45   : > { %2238 = vmatpush3.msra.mxu1 %v1745_v42  ;;  %2052 = vmatprep.subr.mxu0 %v1744_v43 }
  0x46   : > { %2223 = vmatprep.subr.mxu1 %v1744_v43  ;;  %2053 = vmatpush3.msra.mxu0 %v1744_v43 }
  0x47   : > { %2239 = vmatpush3.msra.mxu1 %v1744_v43  ;;  %2054 = vmatprep.subr.mxu0 %v1743_v45  ;;  %v1751_v43 = vld [vmem:[%s2921_s2] ss:$0 sm:$0xff] }
  0x48   : > { %2224 = vmatprep.subr.mxu1 %v1743_v45  ;;  %2055 = vmatpush3.msra.mxu0 %v1743_v45 }
  0x49   : > { %2240 = vmatpush3.msra.mxu1 %v1743_v45  ;;  %2056 = vmatprep.subr.mxu0 %v1742_v48 }
  0x4a   : > { %2225 = vmatprep.subr.mxu1 %v1742_v48  ;;  %2057 = vmatpush3.msra.mxu0 %v1742_v48 }
  0x4b   : > { %2241 = vmatpush3.msra.mxu1 %v1742_v48  ;;  %2058 = vmatprep.subr.mxu0 %v1741_v50 }
  0x4c   : > { %2226 = vmatprep.subr.mxu1 %v1741_v50  ;;  %1989 = vmatprep.mubr.f32.mxu0 %v2547_v44 }
  0x4d   : > { %2033 = vmatprep.mubr.f32.mxu1 %v404_v52  ;;  %2059 = vmatpush3.msra.mxu0 %v1741_v50 }
  0x4e   : > { %2242 = vmatpush3.msra.mxu1 %v1741_v50  ;;  %1990 = vmatmul.mubr.f32.gmra.mxu0 %v2555_v46  ;;  %v839_v46 = vadd.s32 16, %v837_v38 }
  0x4f   : > { %2034 = vmatmul.mubr.f32.gmra.mxu1 %v406_v54  ;;  %2060 = vmatprep.subr.mxu0 %v1740_v56 }
  0x50   : > { %2227 = vmatprep.subr.mxu1 %v1740_v56  ;;  %2061 = vmatpush3.msra.mxu0 %v1740_v56  ;;  %vm849_vm4 = vcmp.le.s32.totalorder %v839_v46, 16 }
  0x51   : > { %2243 = vmatpush3.msra.mxu1 %v1740_v56  ;;  %2062 = vmatprep.subr.mxu0 %v1739_v58 }
  0x52   : > { %2228 = vmatprep.subr.mxu1 %v1739_v58  ;;  %1992 = vmatprep.mubr.f32.mxu0 %v2568_v51 }
  0x53   : > { %2036 = vmatprep.mubr.f32.mxu1 %v408_v60  ;;  %2063 = vmatpush3.msra.mxu0 %v1739_v58 }
  0x54   : > { %2244 = vmatpush3.msra.mxu1 %v1739_v58  ;;  %1993 = vmatmul.mubr.f32.gmra.mxu0 %v2576_v53 }
  0x55   : > { %2037 = vmatmul.mubr.f32.gmra.mxu1 %v410_v62  ;;  %2064 = vmatprep.subr.mxu0 %v1738_v0 }
  0x56   : > { %2229 = vmatprep.subr.mxu1 %v1738_v0  ;;  %2065 = vmatpush3.msra.mxu0 %v1738_v0 }
  0x57   : > { %2245 = vmatpush3.msra.mxu1 %v1738_v0  ;;  %2066 = vmatprep.subr.mxu0 %v1737_v2 }
  0x58   : > { %2230 = vmatprep.subr.mxu1 %v1737_v2  ;;  %1995 = vmatprep.mubr.f32.mxu0 %v2592_v59  ;;  %v2338_v59 = vmov 0.0  }
  0x59   : > { %2039 = vmatprep.mubr.f32.mxu1 %v412_v3  ;;  %2067 = vmatpush3.msra.mxu0 %v1737_v2  ;;  %v1752_v60 = vsel %vm843_vm3, 1.0, %v2338_v59  ;;  %v1753_v12 = vsel %vm849_vm4, 1.0, %v2338_v59 }
  0x5a   : > { %2246 = vmatpush3.msra.mxu1 %v1737_v2  ;;  %1996 = vmatmul.mubr.f32.gmra.mxu0 %v2598_v61 }
  0x5b   : > { %2040 = vmatmul.mubr.f32.gmra.mxu1 %v414_v4  ;;  %2068 = vmatprep.subr.mxu0 %v1736_v5 }
  0x5c   : > { %2231 = vmatprep.subr.mxu1 %v1736_v5  ;;  %2069 = vmatpush3.msra.mxu0 %v1736_v5 }
  0x5d   : > { %2247 = vmatpush3.msra.mxu1 %v1736_v5  ;;  %2070 = vmatprep.subr.mxu0 %v1735_v10 }
  0x5e   : > { %2232 = vmatprep.subr.mxu1 %v1735_v10  ;;  %2071 = vmatpush3.msra.mxu0 %v1735_v10 }
  0x5f   : > { %2248 = vmatpush3.msra.mxu1 %v1735_v10  ;;  %2072 = vmatprep.subr.mxu0 %v1734_v15 }
  0x60   : > { %2233 = vmatprep.subr.mxu1 %v1734_v15  ;;  %2073 = vmatpush3.msra.mxu0 %v1734_v15 }
  0x61   : > { %2249 = vmatpush3.msra.mxu1 %v1734_v15  ;;  %2074 = vmatprep.mubr.f32.mxu0 %v427_v16 }
  0x62   : > { %2080 = vmatprep.mubr.f32.mxu1 %v435_v17  ;;  %2075 = vmatmul.mubr.f32.vlgmr.msra.gmra.mxu0 %v429_v18 }
  0x63   : > { %2081 = vmatmul.mubr.f32.vlgmr.msra.gmra.mxu1 %v437_v19  ;;  %2077 = vmatprep.mubr.f32.mxu0 %v431_v20 }
  0x64   : > { %2083 = vmatprep.mubr.f32.mxu1 %v439_v21 }
  0x66   : > { %2078 = vmatmul.mubr.f32.gmra.mxu0 %v433_v22 }
  0x67   : > { %2084 = vmatmul.mubr.msk.f32.gmra.mxu1 %vm424_vm2, %v438_v14 }
  0xfa   : > { %v1988_v23 = vpop.f32.mrf.mxu0 }
  0xfb   : > { %v2032_v24 = vpop.f32.mrf.mxu1 }
  0xfc   : > { %v548_v25 = vpop.f32.mrf.mxu0  ;;  %v659_v41 = vadd.f32 %v2032_v24, %v1988_v23 }
  0xfd   : > { %v653_v26 = vpop.f32.mrf.mxu1 }
  0xfe   : > { %v654_v47 = vadd.f32 %v653_v26, %v548_v25 }
 0x10e   : > { %v1991_v27 = vpop.f32.mrf.mxu0 }
 0x10f   : > { %v2035_v28 = vpop.f32.mrf.mxu1 }
 0x110   : > { %v558_v29 = vpop.f32.mrf.mxu0  ;;  %v669_v57 = vadd.f32 %v2035_v28, %v1991_v27 }
 0x111   : > { %v663_v30 = vpop.f32.mrf.mxu1 }
 0x112   : > { %v664_v63 = vadd.f32 %v663_v30, %v558_v29 }
 0x114   : > { %v1994_v31 = vpop.f32.mrf.mxu0 }
 0x115   : > { %v2038_v32 = vpop.f32.mrf.mxu1 }
 0x116   : > { %v568_v33 = vpop.f32.mrf.mxu0  ;;  %v679_v42 = vadd.f32 %v2038_v32, %v1994_v31 }
 0x117   : > { %v673_v34 = vpop.f32.mrf.mxu1 }
 0x118   : > { %v674_v48 = vadd.f32 %v673_v34, %v568_v33 }
 0x11a   : > { %v1997_v36 = vpop.f32.mrf.mxu0 }
 0x11b   : > { %v2041_v37 = vpop.f32.mrf.mxu1 }
 0x11c   : > { %v578_v39 = vpop.f32.mrf.mxu0  ;;  %v689_v58 = vadd.f32 %v2041_v37, %v1997_v36 }
 0x11d   : > { %v683_v40 = vpop.f32.mrf.mxu1 }
 0x11e   : > { %v684_v0 = vadd.f32 %v683_v40, %v578_v39 }
 0x122   : > { %v2076_v44 = vpop.f32.mrf.mxu0 }
 0x123   : > { %v2082_v45 = vpop.f32.mrf.mxu1  ;;  %v815_v49 = vadd.f32 %v2076_v44, %v659_v41 }
 0x124   : > { %v819_v50 = vadd.f32 %v2082_v45, %v679_v42  ;;  %v775_v51 = vpop.f32.mrf.mxu0 }
 0x125   : > { %v795_v52 = vpop.f32.mrf.mxu1  ;;  %v829_v53 = vadd.f32 %v1751_v43, %v815_v49  ;;  %v814_v55 = vadd.f32 %v775_v51, %v654_v47  ;;  %v890_v51 = vld [vmem:[#allocation3] sm:$0x1] }
 0x126   : > { %v833_v54 = vadd.f32 %v1751_v43, %v819_v50  ;;  %v818_v56 = vadd.f32 %v795_v52, %v674_v48  ;;  %v2079_v61 = vpop.f32.mrf.mxu0 }
 0x127   : > { %v2085_v62 = vpop.f32.mrf.mxu1  ;;  %933 = vst [vmem:[#allocation2] sm:$0xff] %v829_v53  ;;  %v828_v1 = vadd.f32 %v1751_v43, %v814_v55  ;;  %v817_v3 = vadd.f32 %v2079_v61, %v669_v57  ;;  %v908_v16 = vmul.f32 %v829_v53, %v829_v53 }
 0x128   : > { %937 = vst [vmem:[#allocation2 + $0x20] sm:$0xff] %v833_v54  ;;  %v832_v2 = vadd.f32 %v1751_v43, %v818_v56  ;;  %v821_v4 = vadd.f32 %v2085_v62, %v689_v58  ;;  %v785_v5 = vpop.f32.mrf.mxu0  ;;  %v912_v31 = vmul.f32 %v833_v54, %v833_v54 }
 0x129   : > { %v805_v6 = vpop.f32.mrf.mxu1  ;;  %v882_v7 = vmul.f32 %v1752_v60, %v828_v1  ;;  %932 = vst [vmem:[#allocation2 + $0x30] sm:$0xff] %v828_v1  ;;  %v816_v8 = vadd.f32 %v785_v5, %v664_v63  ;;  %v831_v10 = vadd.f32 %v1751_v43, %v817_v3 }
 0x12a   : > { %936 = vst [vmem:[#allocation2 + $0x8] sm:$0xff] %v832_v2  ;;  %v820_v9 = vadd.f32 %v805_v6, %v684_v0  ;;  %v835_v11 = vadd.f32 %v1751_v43, %v821_v4  ;;  %v886_v21 = vmul.f32 %v1752_v60, %v832_v2 }
 0x12b   : > { %v907_v13 = vmul.f32 %v882_v7, %v828_v1  ;;  %v830_v14 = vadd.f32 %v1751_v43, %v816_v8  ;;  %935 = vst [vmem:[#allocation2 + $0x10] sm:$0xff] %v831_v10  ;;  %v891_v17 = vadd.f32 %v882_v7, %v829_v53  ;;  %v885_v18 = vmul.f32 0.0, %v831_v10 }
 0x12c   : > { %939 = vst [vmem:[#allocation2 + $0x38] sm:$0xff] %v835_v11  ;;  %v834_v15 = vadd.f32 %v1751_v43, %v820_v9  ;;  %v911_v27 = vmul.f32 %v886_v21, %v832_v2  ;;  %v889_v32 = vmul.f32 0.0, %v835_v11 }
 0x12d   : > { %v884_v19 = vmul.f32 %v1753_v12, %v830_v14  ;;  %934 = vst [vmem:[#allocation2 + $0x18] sm:$0xff] %v830_v14  ;;  %v915_v20 = vadd.f32 %v908_v16, %v907_v13  ;;  %v910_v24 = vmul.f32 %v885_v18, %v831_v10 }
 0x12e   : > { %938 = vst [vmem:[#allocation2 + $0x28] sm:$0xff] %v834_v15  ;;  %v888_v29 = vmul.f32 %v1753_v12, %v834_v15  ;;  %v914_v38 = vmul.f32 %v889_v32, %v835_v11 }
 0x12f   : > { %v892_v22 = vadd.f32 %v891_v17, %v884_v19  ;;  %v909_v23 = vmul.f32 %v884_v19, %v830_v14 }
 0x130   : > { %v913_v36 = vmul.f32 %v888_v29, %v834_v15 }
 0x131   : > { %v893_v25 = vadd.f32 %v892_v22, %v885_v18  ;;  %v916_v26 = vadd.f32 %v915_v20, %v909_v23 }
 0x133   : > { %v917_v28 = vadd.f32 %v916_v26, %v910_v24  ;;  %v894_v30 = vadd.f32 %v893_v25, %v886_v21 }
 0x135   : > { %v895_v33 = vadd.f32 %v894_v30, %v833_v54  ;;  %v918_v34 = vadd.f32 %v917_v28, %v911_v27  ;;  %v906_v54 = vld [vmem:[#allocation3 + $0x1] sm:$0x1] }
 0x137   : > { %v896_v35 = vadd.f32 %v895_v33, %v888_v29  ;;  %v919_v37 = vadd.f32 %v918_v34, %v912_v31 }
 0x139   : > { %v897_v39 = vadd.f32 %v896_v35, %v889_v32  ;;  %v920_v40 = vadd.f32 %v919_v37, %v913_v36 }
 0x13b   : > { %v898_v41 = vrot.slane %v897_v39, 4  ;;  %v921_v42 = vadd.f32 %v920_v40, %v914_v38 }
 0x13d   : > { %v899_v43 = vadd.f32 %v898_v41, %v897_v39  ;;  %v922_v44 = vrot.slane %v921_v42, 4 }
 0x13f   : > { %v900_v45 = vrot.slane %v899_v43, 2  ;;  %v923_v46 = vadd.f32 %v922_v44, %v921_v42 }
 0x141   : > { %v901_v47 = vadd.f32 %v900_v45, %v899_v43  ;;  %v924_v48 = vrot.slane %v923_v46, 2 }
 0x143   : > { %v902_v49 = vrot.slane %v901_v47, 1  ;;  %v925_v50 = vadd.f32 %v924_v48, %v923_v46 }
 0x145   : > { %v903_v52 = vadd.f32 %v902_v49, %v901_v47  ;;  %v926_v53 = vrot.slane %v925_v50, 1 }
 0x147   : > { %v904_v55 = vadd.f32 %v903_v52, %v890_v51  ;;  %v927_v56 = vadd.f32 %v926_v53, %v925_v50 }
 0x149   : > { %905 = vst [vmem:[#allocation3] sm:$0x1] %v904_v55  ;;  %v928_v57 = vadd.f32 %v927_v56, %v906_v54 }
 0x14b   : > { %929 = vst [vmem:[#allocation3 + $0x1] sm:$0x1] %v928_v57 }
 0x14c PF: > { %p1756_p6 = scmp.ne.s32.totalorder %s2327_s30, 1 }
 0x14e   : > { %943 = sbr.rel (%p1756_p6) target bundleno = 662 (0x296), region = 68 }
 0x153   : > { %v1778_v58 = vld [vmem:[%s2924_s5 + $0xf8] sm:$0xff]  ;;  %v1777_v59 = vld [vmem:[%s2924_s5 + $0xf0] sm:$0xff]  ;;  %v1776_v62 = vld [vmem:[%s2924_s5 + $0xe8] sm:$0xff]  ;;  %v963_v41 = vlaneseq  ;;  %v2339_v53 = vmov 0.0   ;;  %vm1070_vm6 = vcmask 1040384   ;;  %vm1095_vm9 = vcmask 1046528  }
 0x154   : > { %v1135_v60 = vld [vmem:[%s2924_s5 + $0x78] sm:$0xff]  ;;  %2086 = vmatprep.subr.mxu0 %v1778_v58  ;;  %v1134_v61 = vld [vmem:[%s2924_s5 + $0x70] sm:$0xff]  ;;  %v1133_v63 = vld [vmem:[%s2924_s5 + $0x68] sm:$0xff] }
 0x155   : > { %2130 = vmatprep.subr.mxu1 %v1135_v60  ;;  %2087 = vmatpush3.msra.mxu0 %v1778_v58  ;;  %v1775_v0 = vld [vmem:[%s2924_s5 + $0xe0] sm:$0xff]  ;;  %v1774_v2 = vld [vmem:[%s2924_s5 + $0xd8] sm:$0xff]  ;;  %v1773_v4 = vld [vmem:[%s2924_s5 + $0xd0] sm:$0xff]  ;;  %v964_v44 = vshrl.u32 %v963_v41, 7 }
 0x156   : > { %2131 = vmatpush3.msra.mxu1 %v1135_v60  ;;  %2088 = vmatprep.subr.mxu0 %v1777_v59  ;;  %v1132_v1 = vld [vmem:[%s2924_s5 + $0x60] sm:$0xff]  ;;  %v1131_v3 = vld [vmem:[%s2924_s5 + $0x58] sm:$0xff]  ;;  %v1130_v5 = vld [vmem:[%s2924_s5 + $0x50] sm:$0xff] }
 0x157   : > { %2132 = vmatprep.subr.mxu1 %v1134_v61  ;;  %2089 = vmatpush3.msra.mxu0 %v1777_v59  ;;  %v1772_v6 = vld [vmem:[%s2924_s5 + $0xc8] sm:$0xff]  ;;  %v947_v8 = vld [vmem:[#allocation3] sm:$0x1]  ;;  %v948_v9 = vld [vmem:[#allocation3 + $0x1] sm:$0x1]  ;;  %vm970_vm5 = vcmp.ge.s32.totalorder %v964_v44, 1 }
 0x158   : > { %2133 = vmatpush3.msra.mxu1 %v1134_v61  ;;  %2090 = vmatprep.subr.mxu0 %v1776_v62  ;;  %v1129_v7 = vld [vmem:[%s2924_s5 + $0x48] sm:$0xff]  ;;  %v2687_v10 = vmul.f32 0.03125, %v947_v8  ;;  %v952_v11 = vmul.f32 0.03125, %v948_v9  ;;  %v1771_v12 = vld [vmem:[%s2924_s5 + $0xc0] sm:$0xff]  ;;  %v1770_v15 = vld [vmem:[%s2924_s5 + $0xb8] sm:$0xff]  ;;  %v2759_v54 = vsel %vm970_vm5, 1.0, %v2339_v53 }
 0x159   : > { %2134 = vmatprep.subr.mxu1 %v1133_v63  ;;  %2091 = vmatpush3.msra.mxu0 %v1776_v62  ;;  %v1128_v13 = vld [vmem:[%s2924_s5 + $0x40] sm:$0xff]  ;;  %v1127_v16 = vld [vmem:[%s2924_s5 + $0x38] sm:$0xff]  ;;  %v1769_v18 = vld [vmem:[%s2924_s5 + $0xb0] sm:$0xff]  ;;  %v966_v58 = vadd.s32 16, %v964_v44 }
 0x15a   : > { %2135 = vmatpush3.msra.mxu1 %v1133_v63  ;;  %2092 = vmatprep.subr.mxu0 %v1775_v0  ;;  %v953_v14 = vmul.f32 %v2687_v10, %v2687_v10  ;;  %v1126_v19 = vld [vmem:[%s2924_s5 + $0x30] sm:$0xff]  ;;  %v1768_v21 = vld [vmem:[%s2924_s5 + $0xa8] sm:$0xff]  ;;  %v1767_v24 = vld [vmem:[%s2924_s5 + $0xa0] sm:$0xff] }
 0x15b   : > { %2136 = vmatprep.subr.mxu1 %v1132_v1  ;;  %2093 = vmatpush3.msra.mxu0 %v1775_v0  ;;  %v1125_v22 = vld [vmem:[%s2924_s5 + $0x28] sm:$0xff]  ;;  %v1124_v25 = vld [vmem:[%s2924_s5 + $0x20] sm:$0xff]  ;;  %v1766_v26 = vld [vmem:[%s2924_s5 + $0x98] sm:$0xff]  ;;  %vm976_vm8 = vcmp.le.s32.totalorder %v966_v58, 16 }
 0x15c   : > { %2137 = vmatpush3.msra.mxu1 %v1132_v1  ;;  %2094 = vmatprep.subr.mxu0 %v1774_v2  ;;  %v954_v17 = vsub.f32 %v952_v11, %v953_v14  ;;  %v1123_v27 = vld [vmem:[%s2924_s5 + $0x18] sm:$0xff]  ;;  %v1765_v28 = vld [vmem:[%s2924_s5 + $0x90] sm:$0xff]  ;;  %v1764_v30 = vld [vmem:[%s2924_s5 + $0x88] sm:$0xff]  ;;  %v2785_v8 = vsel %vm976_vm8, 1.0, %v2339_v53 }
 0x15d   : > { %2138 = vmatprep.subr.mxu1 %v1131_v3  ;;  %2095 = vmatpush3.msra.mxu0 %v1774_v2  ;;  %v1122_v29 = vld [vmem:[%s2924_s5 + $0x10] sm:$0xff]  ;;  %v1121_v31 = vld [vmem:[%s2924_s5 + $0x8] sm:$0xff]  ;;  %v1763_v32 = vld [vmem:[%s2924_s5 + $0x80] sm:$0xff] }
 0x15e   : > { %2139 = vmatpush3.msra.mxu1 %v1131_v3  ;;  %2096 = vmatprep.subr.mxu0 %v1773_v4  ;;  %v955_v20 = vmax.f32 %v954_v17, 0.0  ;;  %v1120_v33 = vld [vmem:[%s2924_s5] sm:$0xff]  ;;  %v1796_v34 = vld [vmem:[%s2924_s5 + $0x178] sm:$0xff]  ;;  %v1011_v42 = vld [vmem:[#allocation2 + $0x30] sm:$0xff] }
 0x15f   : > { %2140 = vmatprep.subr.mxu1 %v1130_v5  ;;  %2097 = vmatpush3.msra.mxu0 %v1773_v4  ;;  %v949_v35 = vld [vmem:[%s2922_s3] sm:$0x1]  ;;  %v1013_v48 = vld [vmem:[#allocation2 + $0x18] sm:$0xff]  ;;  %v1014_v52 = vld [vmem:[#allocation2 + $0x10] sm:$0xff] }
 0x160   : > { %2141 = vmatpush3.msra.mxu1 %v1130_v5  ;;  %2098 = vmatprep.subr.mxu0 %v1772_v6  ;;  %v956_v23 = vadd.f32 1e-05, %v955_v20  ;;  %v950_v38 = vld [vmem:[%s2923_s4] sm:$0x1]  ;;  %v1015_v62 = vld [vmem:[#allocation2 + $0x8] sm:$0xff]  ;;  %vm1779_vm7 = vmneg %vm1070_vm6 }
 0x161   : > { %2142 = vmatprep.subr.mxu1 %v1129_v7  ;;  %2099 = vmatpush3.msra.mxu0 %v1772_v6  ;;  %v1012_v43 = vld [vmem:[#allocation2] sm:$0xff]  ;;  %v1795_v1 = vld [vmem:[%s2924_s5 + $0x170] sm:$0xff]  ;;  %v1794_v5 = vld [vmem:[%s2924_s5 + $0x168] sm:$0xff] }
 0x162   : > { %2143 = vmatpush3.msra.mxu1 %v1129_v7  ;;  %2100 = vmatprep.subr.mxu0 %v1771_v12  ;;  %2309 = vrsqrt.f32 %v956_v23  ;;  %v1793_v7 = vld [vmem:[%s2924_s5 + $0x160] sm:$0xff]  ;;  %v1018_v14 = vld [vmem:[#allocation2 + $0x38] sm:$0xff] }
 0x163   : > { %2144 = vmatprep.subr.mxu1 %v1128_v13  ;;  %2101 = vmatpush3.msra.mxu0 %v1771_v12  ;;  %v1016_v9 = vld [vmem:[#allocation2 + $0x20] sm:$0xff] }
 0x164   : > { %2145 = vmatpush3.msra.mxu1 %v1128_v13  ;;  %2102 = vmatprep.subr.mxu0 %v1770_v15  ;;  %v1792_v13 = vld [vmem:[%s2924_s5 + $0x158] sm:$0xff] }
 0x165   : > { %2146 = vmatprep.subr.mxu1 %v1127_v16  ;;  %2103 = vmatpush3.msra.mxu0 %v1770_v15 }
 0x166   : > { %2147 = vmatpush3.msra.mxu1 %v1127_v16  ;;  %2104 = vmatprep.subr.mxu0 %v1769_v18 }
 0x167   : > { %2148 = vmatprep.subr.mxu1 %v1126_v19  ;;  %2105 = vmatpush3.msra.mxu0 %v1769_v18  ;;  %v1791_v18 = vld [vmem:[%s2924_s5 + $0x150] sm:$0xff] }
 0x168   : > { %2149 = vmatpush3.msra.mxu1 %v1126_v19  ;;  %2106 = vmatprep.subr.mxu0 %v1768_v21 }
 0x169   : > { %2150 = vmatprep.subr.mxu1 %v1125_v22  ;;  %2107 = vmatpush3.msra.mxu0 %v1768_v21 }
 0x16a   : > { %2151 = vmatpush3.msra.mxu1 %v1125_v22  ;;  %2108 = vmatprep.subr.mxu0 %v1767_v24  ;;  %v1790_v22 = vld [vmem:[%s2924_s5 + $0x148] sm:$0xff] }
 0x16b   : > { %2152 = vmatprep.subr.mxu1 %v1124_v25  ;;  %2109 = vmatpush3.msra.mxu0 %v1767_v24 }
 0x16c   : > { %2153 = vmatpush3.msra.mxu1 %v1124_v25  ;;  %2110 = vmatprep.subr.mxu0 %v1766_v26 }
 0x16d   : > { %2154 = vmatprep.subr.mxu1 %v1123_v27  ;;  %2111 = vmatpush3.msra.mxu0 %v1766_v26  ;;  %v1789_v26 = vld [vmem:[%s2924_s5 + $0x140] sm:$0xff] }
 0x16e   : > { %2155 = vmatpush3.msra.mxu1 %v1123_v27  ;;  %2112 = vmatprep.subr.mxu0 %v1765_v28 }
 0x16f   : > { %2156 = vmatprep.subr.mxu1 %v1122_v29  ;;  %2113 = vmatpush3.msra.mxu0 %v1765_v28  ;;  %v2310_v36 = vpop.eup %2309 }
 0x170   : > { %2157 = vmatpush3.msra.mxu1 %v1122_v29  ;;  %2114 = vmatprep.subr.mxu0 %v1764_v30  ;;  %v958_v37 = vmul.f32 %v2310_v36, %v949_v35 }
 0x171   : > { %2158 = vmatprep.subr.mxu1 %v1121_v31  ;;  %2115 = vmatpush3.msra.mxu0 %v1764_v30  ;;  %v1788_v30 = vld [vmem:[%s2924_s5 + $0x138] sm:$0xff] }
 0x172   : > { %2159 = vmatpush3.msra.mxu1 %v1121_v31  ;;  %2116 = vmatprep.subr.mxu0 %v1763_v32  ;;  %v959_v39 = vmul.f32 %v958_v37, %v2687_v10  ;;  %961 = vst [vmem:[#allocation3 + $0x4] sm:$0x1] %v958_v37  ;;  %v1017_v10 = vld [vmem:[#allocation2 + $0x28] sm:$0xff]  ;;  %v1787_v37 = vld [vmem:[%s2924_s5 + $0x130] sm:$0xff] }
 0x173   : > { %2160 = vmatprep.subr.mxu1 %v1120_v33  ;;  %2117 = vmatpush3.msra.mxu0 %v1763_v32 }
 0x174   : > { %2161 = vmatpush3.msra.mxu1 %v1120_v33  ;;  %2174 = vmatprep.subr.mxu0 %v1796_v34  ;;  %v960_v40 = vsub.f32 %v950_v38, %v959_v39 }
 0x175   : > { %2250 = vmatprep.subr.mxu1 %v1796_v34 }
 0x176   : > { %962 = vst [vmem:[#allocation3 + $0x5] sm:$0x1] %v960_v40  ;;  %v1786_v40 = vld [vmem:[%s2924_s5 + $0x128] sm:$0xff] }
 0x179   : > { %v1761_v45 = vld [vmem:[#allocation3 + $0x4] ss:$0 sm:$0xff] }
 0x17a   : > { %v1024_v46 = vmul.f32 %v1761_v45, %v1011_v42  ;;  %v1025_v47 = vmul.f32 %v1761_v45, %v1012_v43  ;;  %v1026_v55 = vmul.f32 %v1761_v45, %v1013_v48  ;;  %v1027_v59 = vmul.f32 %v1761_v45, %v1014_v52 }
 0x17b   : > { %v1028_v3 = vmul.f32 %v1761_v45, %v1015_v62  ;;  %v1029_v16 = vmul.f32 %v1761_v45, %v1016_v9  ;;  %v1030_v17 = vmul.f32 %v1761_v45, %v1017_v10  ;;  %v1031_v21 = vmul.f32 %v1761_v45, %v1018_v14  ;;  %v1785_v45 = vld [vmem:[%s2924_s5 + $0x120] sm:$0xff] }
 0x17d   : > { %v2755_v49 = vld [vmem:[#allocation3 + $0x5] ss:$0 sm:$0xff] }
 0x17e   : > { %v1037_v50 = vadd.f32 %v2755_v49, %v1024_v46  ;;  %v1038_v51 = vadd.f32 %v2755_v49, %v1025_v47  ;;  %v1039_v63 = vadd.f32 %v2755_v49, %v1026_v55  ;;  %v1040_v2 = vadd.f32 %v2755_v49, %v1027_v59  ;;  %v1784_v47 = vld [vmem:[%s2924_s5 + $0x118] sm:$0xff] }
 0x17f   : > { %v1041_v12 = vadd.f32 %v2755_v49, %v1028_v3  ;;  %v1042_v24 = vadd.f32 %v2755_v49, %v1029_v16  ;;  %v1043_v25 = vadd.f32 %v2755_v49, %v1030_v17  ;;  %v1044_v29 = vadd.f32 %v2755_v49, %v1031_v21 }
 0x180   : > { %v1045_v56 = vmax.f32 %v1037_v50, 0.0  ;;  %v2761_v57 = vmax.f32 %v1038_v51, 0.0  ;;  %v1047_v6 = vmax.f32 %v1039_v63, 0.0  ;;  %v1048_v11 = vmax.f32 %v1040_v2, 0.0  ;;  %v1783_v50 = vld [vmem:[%s2924_s5 + $0x110] sm:$0xff]  ;;  %v1782_v51 = vld [vmem:[%s2924_s5 + $0x108] sm:$0xff] }
 0x181   : > { %v1049_v20 = vmax.f32 %v1041_v12, 0.0  ;;  %v2819_v32 = vmax.f32 %v1042_v24, 0.0  ;;  %v1051_v33 = vmax.f32 %v1043_v25, 0.0  ;;  %v1052_v36 = vmax.f32 %v1044_v29, 0.0 }
 0x182   : > { %v2764_v60 = vmul.f32 %v2759_v54, %v1045_v56  ;;  %v1072_v61 = vrot.slane %v2761_v57, 7  ;;  %v2792_v15 = vmul.f32 %v2785_v8, %v1047_v6  ;;  %v2797_v19 = vmul.f32 0.0, %v1048_v11  ;;  %v1781_v56 = vld [vmem:[%s2924_s5 + $0x100] sm:$0xff] }
 0x183   : > { %v2810_v28 = vmul.f32 %v2759_v54, %v1049_v20  ;;  %v1080_v38 = vrot.slane %v2819_v32, 7  ;;  %v2829_v39 = vmul.f32 %v2785_v8, %v1051_v33  ;;  %v2836_v42 = vmul.f32 0.0, %v1052_v36 }
 0x184   : > { %2118 = vmatprep.mubr.f32.mxu0 %v2764_v60  ;;  %v1071_v0 = vrot.slane %v2764_v60, 7  ;;  %v1074_v23 = vrot.slane %v2792_v15, 7  ;;  %v1076_v27 = vrot.slane %v2797_v19, 7  ;;  %v1096_v52 = vrot.slane %v2764_v60, 1 }
 0x185   : > { %2119 = vmatmul.mubr.f32.vlgmr.msra.gmra.mxu0 %v2761_v57  ;;  %v1078_v35 = vrot.slane %v2810_v28, 7  ;;  %v1082_v44 = vrot.slane %v2829_v39, 7  ;;  %v1084_v46 = vrot.slane %v2836_v42, 7  ;;  %v1097_v53 = vrot.slane %v2761_v57, 1 }
 0x186   : > { %2175 = vmatpush3.msra.mxu0 %v1796_v34  ;;  %2162 = vmatprep.mubr.msk.f32.mxu1 %vm1779_vm7, %v1071_v0  ;;  %v1073_v4 = vsel %vm1070_vm6, %v1071_v0, %v1072_v61  ;;  %v1075_v31 = vsel %vm1070_vm6, %v1072_v61, %v1074_v23  ;;  %v1099_v55 = vrot.slane %v2792_v15, 1  ;;  %v1103_v58 = vrot.slane %v2810_v28, 1 }
 0x187   : > { %2176 = vmatprep.subr.mxu0 %v1795_v1  ;;  %2163 = vmatmul.mubr.f32.vlgmr.msra.gmra.mxu1 %v1073_v4  ;;  %v1079_v41 = vsel %vm1070_vm6, %v1076_v27, %v1078_v35  ;;  %v1081_v43 = vsel %vm1070_vm6, %v1078_v35, %v1080_v38  ;;  %v1083_v48 = vsel %vm1070_vm6, %v1080_v38, %v1082_v44  ;;  %v1105_v59 = vrot.slane %v2819_v32, 1 }
 0x188   : > { %2266 = vmatpush3.msra.mxu1 %v1796_v34  ;;  %2177 = vmatpush3.msra.mxu0 %v1795_v1  ;;  %v1077_v34 = vsel %vm1070_vm6, %v1074_v23, %v1076_v27  ;;  %v1085_v49 = vsel %vm1070_vm6, %v1082_v44, %v1084_v46  ;;  %v1101_v61 = vrot.slane %v2797_v19, 1  ;;  %v1107_v60 = vrot.slane %v2829_v39, 1  ;;  %v1798_v23 = vld [vmem:[%s2925_s6] ss:$0 sm:$0xff] }
 0x189   : > { %2251 = vmatprep.subr.mxu1 %v1795_v1  ;;  %2178 = vmatprep.subr.mxu0 %v1794_v5  ;;  %v1098_v57 = vsel %vm1095_vm9, %v1096_v52, %v1097_v53  ;;  %v1109_v62 = vrot.slane %v2836_v42, 1  ;;  %v1100_v63 = vsel %vm1095_vm9, %v1097_v53, %v1099_v55  ;;  %v1106_v0 = vsel %vm1095_vm9, %v1103_v58, %v1105_v59 }
 0x18a   : > { %2267 = vmatpush3.msra.mxu1 %v1795_v1  ;;  %2179 = vmatpush3.msra.mxu0 %v1794_v5  ;;  %v1102_v1 = vsel %vm1095_vm9, %v1099_v55, %v1101_v61  ;;  %v1108_v2 = vsel %vm1095_vm9, %v1105_v59, %v1107_v60  ;;  %v1104_v4 = vsel %vm1095_vm9, %v1101_v61, %v1103_v58 }
 0x18b   : > { %2252 = vmatprep.subr.mxu1 %v1794_v5  ;;  %2180 = vmatprep.subr.mxu0 %v1793_v7  ;;  %v1110_v3 = vsel %vm1095_vm9, %v1107_v60, %v1109_v62 }
 0x18c   : > { %2268 = vmatpush3.msra.mxu1 %v1794_v5  ;;  %2181 = vmatpush3.msra.mxu0 %v1793_v7 }
 0x18d   : > { %2253 = vmatprep.subr.mxu1 %v1793_v7  ;;  %2182 = vmatprep.subr.mxu0 %v1792_v13 }
 0x18e   : > { %2269 = vmatpush3.msra.mxu1 %v1793_v7  ;;  %2183 = vmatpush3.msra.mxu0 %v1792_v13 }
 0x18f   : > { %2254 = vmatprep.subr.mxu1 %v1792_v13  ;;  %2184 = vmatprep.subr.mxu0 %v1791_v18 }
 0x190   : > { %2270 = vmatpush3.msra.mxu1 %v1792_v13  ;;  %2185 = vmatpush3.msra.mxu0 %v1791_v18 }
 0x191   : > { %2255 = vmatprep.subr.mxu1 %v1791_v18  ;;  %2186 = vmatprep.subr.mxu0 %v1790_v22 }
 0x192   : > { %2271 = vmatpush3.msra.mxu1 %v1791_v18  ;;  %2187 = vmatpush3.msra.mxu0 %v1790_v22 }
 0x193   : > { %2256 = vmatprep.subr.mxu1 %v1790_v22  ;;  %2188 = vmatprep.subr.mxu0 %v1789_v26 }
 0x194   : > { %2272 = vmatpush3.msra.mxu1 %v1790_v22  ;;  %2189 = vmatpush3.msra.mxu0 %v1789_v26 }
 0x195   : > { %2257 = vmatprep.subr.mxu1 %v1789_v26  ;;  %2190 = vmatprep.subr.mxu0 %v1788_v30 }
 0x196   : > { %2121 = vmatprep.mubr.f32.mxu0 %v2792_v15  ;;  %2165 = vmatprep.mubr.f32.mxu1 %v1075_v31 }
 0x197   : > { %2273 = vmatpush3.msra.mxu1 %v1789_v26  ;;  %2191 = vmatpush3.msra.mxu0 %v1788_v30 }
 0x198   : > { %2122 = vmatmul.mubr.f32.gmra.mxu0 %v2797_v19  ;;  %2166 = vmatmul.mubr.f32.gmra.mxu1 %v1077_v34 }
 0x199   : > { %2258 = vmatprep.subr.mxu1 %v1788_v30  ;;  %2192 = vmatprep.subr.mxu0 %v1787_v37 }
 0x19a   : > { %2274 = vmatpush3.msra.mxu1 %v1788_v30  ;;  %2193 = vmatpush3.msra.mxu0 %v1787_v37 }
 0x19b   : > { %2259 = vmatprep.subr.mxu1 %v1787_v37  ;;  %2194 = vmatprep.subr.mxu0 %v1786_v40 }
 0x19c   : > { %2124 = vmatprep.mubr.f32.mxu0 %v2810_v28  ;;  %2168 = vmatprep.mubr.f32.mxu1 %v1079_v41 }
 0x19d   : > { %2275 = vmatpush3.msra.mxu1 %v1787_v37  ;;  %2195 = vmatpush3.msra.mxu0 %v1786_v40 }
 0x19e   : > { %2125 = vmatmul.mubr.f32.gmra.mxu0 %v2819_v32  ;;  %2169 = vmatmul.mubr.f32.gmra.mxu1 %v1081_v43 }
 0x19f   : > { %2260 = vmatprep.subr.mxu1 %v1786_v40  ;;  %2196 = vmatprep.subr.mxu0 %v1785_v45 }
 0x1a0   : > { %2276 = vmatpush3.msra.mxu1 %v1786_v40  ;;  %2197 = vmatpush3.msra.mxu0 %v1785_v45 }
 0x1a1   : > { %2261 = vmatprep.subr.mxu1 %v1785_v45  ;;  %2198 = vmatprep.subr.mxu0 %v1784_v47 }
 0x1a2   : > { %2127 = vmatprep.mubr.f32.mxu0 %v2829_v39  ;;  %2171 = vmatprep.mubr.f32.mxu1 %v1083_v48 }
 0x1a3   : > { %2277 = vmatpush3.msra.mxu1 %v1785_v45  ;;  %2199 = vmatpush3.msra.mxu0 %v1784_v47 }
 0x1a4   : > { %2128 = vmatmul.mubr.f32.gmra.mxu0 %v2836_v42  ;;  %2172 = vmatmul.mubr.f32.gmra.mxu1 %v1085_v49 }
 0x1a5   : > { %2262 = vmatprep.subr.mxu1 %v1784_v47  ;;  %2200 = vmatprep.subr.mxu0 %v1783_v50 }
 0x1a6   : > { %2278 = vmatpush3.msra.mxu1 %v1784_v47  ;;  %2201 = vmatpush3.msra.mxu0 %v1783_v50 }
 0x1a7   : > { %2263 = vmatprep.subr.mxu1 %v1783_v50  ;;  %2202 = vmatprep.subr.mxu0 %v1782_v51 }
 0x1a8   : > { %2279 = vmatpush3.msra.mxu1 %v1783_v50  ;;  %2203 = vmatpush3.msra.mxu0 %v1782_v51 }
 0x1a9   : > { %2264 = vmatprep.subr.mxu1 %v1782_v51  ;;  %2204 = vmatprep.subr.mxu0 %v1781_v56 }
 0x1aa   : > { %2280 = vmatpush3.msra.mxu1 %v1782_v51  ;;  %2205 = vmatpush3.msra.mxu0 %v1781_v56 }
 0x1ab   : > { %2206 = vmatprep.mubr.f32.mxu0 %v1098_v57  ;;  %2265 = vmatprep.subr.mxu1 %v1781_v56 }
 0x1ac   : > { %2207 = vmatmul.mubr.f32.vlgmr.msra.gmra.mxu0 %v1100_v63  ;;  %2281 = vmatpush3.msra.mxu1 %v1781_v56 }
 0x1ad   : > { %2212 = vmatprep.mubr.f32.mxu1 %v1106_v0  ;;  %2209 = vmatprep.mubr.f32.mxu0 %v1102_v1 }
 0x1ae   : > { %2213 = vmatmul.mubr.f32.vlgmr.msra.gmra.mxu1 %v1108_v2 }
 0x1af   : > { %2215 = vmatprep.mubr.f32.mxu1 %v1110_v3 }
 0x1b0   : > { %2210 = vmatmul.mubr.f32.gmra.mxu0 %v1104_v4 }
 0x1b2   : > { %2216 = vmatmul.mubr.msk.f32.gmra.mxu1 %vm1095_vm9, %v1109_v62 }
 0x245   : > { %v2120_v5 = vpop.f32.mrf.mxu0 }
 0x247   : > { %v2164_v6 = vpop.f32.mrf.mxu1  ;;  %v1219_v7 = vpop.f32.mrf.mxu0 }
 0x248   : > { %v1330_v21 = vadd.f32 %v2164_v6, %v2120_v5 }
 0x249   : > { %v1324_v9 = vpop.f32.mrf.mxu1 }
 0x24a   : > { %v1325_v25 = vadd.f32 %v1324_v9, %v1219_v7 }
 0x258   : > { %v2123_v10 = vpop.f32.mrf.mxu0  ;;  %v2167_v11 = vpop.f32.mrf.mxu1 }
 0x259   : > { %v1340_v30 = vadd.f32 %v2167_v11, %v2123_v10 }
 0x25a   : > { %v1229_v12 = vpop.f32.mrf.mxu0  ;;  %v1334_v13 = vpop.f32.mrf.mxu1 }
 0x25b   : > { %v1335_v37 = vadd.f32 %v1334_v13, %v1229_v12 }
 0x25e   : > { %v2126_v14 = vpop.f32.mrf.mxu0  ;;  %v2170_v15 = vpop.f32.mrf.mxu1 }
 0x25f   : > { %v1350_v26 = vadd.f32 %v2170_v15, %v2126_v14 }
 0x260   : > { %v1239_v16 = vpop.f32.mrf.mxu0  ;;  %v1344_v17 = vpop.f32.mrf.mxu1 }
 0x261   : > { %v1345_v34 = vadd.f32 %v1344_v17, %v1239_v16 }
 0x264   : > { %v2129_v18 = vpop.f32.mrf.mxu0  ;;  %v2173_v19 = vpop.f32.mrf.mxu1 }
 0x265   : > { %v1360_v41 = vadd.f32 %v2173_v19, %v2129_v18 }
 0x266   : > { %v1249_v20 = vpop.f32.mrf.mxu0  ;;  %v1354_v22 = vpop.f32.mrf.mxu1 }
 0x267   : > { %v1355_v48 = vadd.f32 %v1354_v22, %v1249_v20 }
 0x26c   : > { %v2208_v24 = vpop.f32.mrf.mxu0 }
 0x26d   : > { %v1486_v27 = vadd.f32 %v2208_v24, %v1330_v21 }
 0x26e   : > { %v1446_v28 = vpop.f32.mrf.mxu0  ;;  %v2214_v29 = vpop.f32.mrf.mxu1 }
 0x26f   : > { %v1500_v31 = vadd.f32 %v1798_v23, %v1486_v27  ;;  %v1485_v32 = vadd.f32 %v1446_v28, %v1325_v25  ;;  %v1490_v33 = vadd.f32 %v2214_v29, %v1350_v26  ;;  %v1515_v28 = vld [vmem:[#allocation3 + $0x2] sm:$0x1] }
 0x270   : > { %v2211_v35 = vpop.f32.mrf.mxu0  ;;  %v1466_v36 = vpop.f32.mrf.mxu1 }
 0x271   : > { %1556 = vst [vmem:[#allocation2] sm:$0xff] %v1500_v31  ;;  %v1499_v38 = vadd.f32 %v1798_v23, %v1485_v32  ;;  %v1504_v39 = vadd.f32 %v1798_v23, %v1490_v33  ;;  %v1488_v40 = vadd.f32 %v2211_v35, %v1340_v30  ;;  %v1489_v42 = vadd.f32 %v1466_v36, %v1345_v34 }
 0x272   : > { %v1456_v43 = vpop.f32.mrf.mxu0  ;;  %v2217_v44 = vpop.f32.mrf.mxu1  ;;  %v1533_v58 = vmul.f32 %v1500_v31, %v1500_v31 }
 0x273   : > { %v1507_v45 = vmul.f32 %v2759_v54, %v1499_v38  ;;  %1555 = vst [vmem:[#allocation2 + $0x30] sm:$0xff] %v1499_v38  ;;  %1560 = vst [vmem:[#allocation2 + $0x20] sm:$0xff] %v1504_v39  ;;  %v1502_v46 = vadd.f32 %v1798_v23, %v1488_v40  ;;  %v1487_v47 = vadd.f32 %v1456_v43, %v1335_v37 }
 0x274   : > { %v1503_v49 = vadd.f32 %v1798_v23, %v1489_v42  ;;  %v1492_v50 = vadd.f32 %v2217_v44, %v1360_v41  ;;  %v1476_v51 = vpop.f32.mrf.mxu1  ;;  %v1537_v10 = vmul.f32 %v1504_v39, %v1504_v39 }
 0x275   : > { %v1532_v52 = vmul.f32 %v1507_v45, %v1499_v38  ;;  %1558 = vst [vmem:[#allocation2 + $0x10] sm:$0xff] %v1502_v46  ;;  %v1501_v53 = vadd.f32 %v1798_v23, %v1487_v47  ;;  %v1491_v56 = vadd.f32 %v1476_v51, %v1355_v48  ;;  %v1516_v59 = vadd.f32 %v1507_v45, %v1500_v31  ;;  %v1531_v31 = vld [vmem:[#allocation3 + $0x3] sm:$0x1] }
 0x276   : > { %1559 = vst [vmem:[#allocation2 + $0x8] sm:$0xff] %v1503_v49  ;;  %v1506_v55 = vadd.f32 %v1798_v23, %v1492_v50  ;;  %v1510_v61 = vmul.f32 0.0, %v1502_v46  ;;  %v1511_v63 = vmul.f32 %v2759_v54, %v1503_v49 }
 0x277   : > { %v1509_v60 = vmul.f32 %v2785_v8, %v1501_v53  ;;  %1557 = vst [vmem:[#allocation2 + $0x18] sm:$0xff] %v1501_v53  ;;  %v1505_v57 = vadd.f32 %v1798_v23, %v1491_v56  ;;  %v1540_v62 = vadd.f32 %v1533_v58, %v1532_v52 }
 0x278   : > { %1562 = vst [vmem:[#allocation2 + $0x38] sm:$0xff] %v1506_v55  ;;  %v1535_v2 = vmul.f32 %v1510_v61, %v1502_v46  ;;  %v1536_v5 = vmul.f32 %v1511_v63, %v1503_v49  ;;  %v1514_v11 = vmul.f32 0.0, %v1506_v55 }
 0x279   : > { %v1517_v0 = vadd.f32 %v1516_v59, %v1509_v60  ;;  %v1534_v1 = vmul.f32 %v1509_v60, %v1501_v53  ;;  %1561 = vst [vmem:[#allocation2 + $0x28] sm:$0xff] %v1505_v57  ;;  %v1513_v7 = vmul.f32 %v2785_v8, %v1505_v57 }
 0x27a   : > { %v1539_v17 = vmul.f32 %v1514_v11, %v1506_v55 }
 0x27b   : > { %v1518_v3 = vadd.f32 %v1517_v0, %v1510_v61  ;;  %v1541_v4 = vadd.f32 %v1540_v62, %v1534_v1  ;;  %v1538_v15 = vmul.f32 %v1513_v7, %v1505_v57 }
 0x27d   : > { %v1542_v6 = vadd.f32 %v1541_v4, %v1535_v2  ;;  %v1519_v9 = vadd.f32 %v1518_v3, %v1511_v63 }
 0x27f   : > { %v1520_v12 = vadd.f32 %v1519_v9, %v1504_v39  ;;  %v1543_v13 = vadd.f32 %v1542_v6, %v1536_v5 }
 0x281   : > { %v1521_v14 = vadd.f32 %v1520_v12, %v1513_v7  ;;  %v1544_v16 = vadd.f32 %v1543_v13, %v1537_v10 }
 0x283   : > { %v1522_v54 = vadd.f32 %v1521_v14, %v1514_v11  ;;  %v1545_v18 = vadd.f32 %v1544_v16, %v1538_v15 }
 0x285   : > { %v1523_v19 = vrot.slane %v1522_v54, 4  ;;  %v1546_v20 = vadd.f32 %v1545_v18, %v1539_v17 }
 0x287   : > { %v1524_v21 = vadd.f32 %v1523_v19, %v1522_v54  ;;  %v1547_v22 = vrot.slane %v1546_v20, 4 }
 0x289   : > { %v1525_v23 = vrot.slane %v1524_v21, 2  ;;  %v1548_v24 = vadd.f32 %v1547_v22, %v1546_v20 }
 0x28b   : > { %v1526_v25 = vadd.f32 %v1525_v23, %v1524_v21  ;;  %v1549_v26 = vrot.slane %v1548_v24, 2 }
 0x28d   : > { %v1527_v8 = vrot.slane %v1526_v25, 1  ;;  %v1550_v27 = vadd.f32 %v1549_v26, %v1548_v24 }
 0x28f   : > { %v1528_v29 = vadd.f32 %v1527_v8, %v1526_v25  ;;  %v1551_v30 = vrot.slane %v1550_v27, 1 }
 0x291   : > { %v1529_v32 = vadd.f32 %v1528_v29, %v1515_v28  ;;  %v1552_v33 = vadd.f32 %v1551_v30, %v1550_v27 }
 0x293   : > { %1530 = vst [vmem:[#allocation3 + $0x2] sm:$0x1] %v1529_v32  ;;  %v1553_v34 = vadd.f32 %v1552_v33, %v1531_v31 }
 0x295   : > { %1554 = vst [vmem:[#allocation3 + $0x3] sm:$0x1] %v1553_v34 }
 0x296 PF: > { %p1799_p7 = scmp.ne.s32.totalorder %s2327_s30, 2 }
 0x298   : > { %1566 = sbr.rel (%p1799_p7) target bundleno = 715 (0x2cb), region = 76 }
 0x29d   : > { %v1570_v35 = vld [vmem:[#allocation3 + $0x2] sm:$0x1]  ;;  %v1571_v36 = vld [vmem:[#allocation3 + $0x3] sm:$0x1]  ;;  %v1572_v43 = vld [vmem:[%s2926_s7] sm:$0x1] }
 0x29e   : > { %v1574_v37 = vmul.f32 0.03125, %v1570_v35  ;;  %v1575_v38 = vmul.f32 0.03125, %v1571_v36  ;;  %v1573_v46 = vld [vmem:[%s2927_s8] sm:$0x1]  ;;  %v1588_v49 = vld [vmem:[#allocation2 + $0x30] sm:$0xff]  ;;  %v1590_v51 = vld [vmem:[#allocation2 + $0x18] sm:$0xff] }
 0x29f   : > { %v1589_v50 = vld [vmem:[#allocation2] sm:$0xff]  ;;  %v1591_v52 = vld [vmem:[#allocation2 + $0x8] sm:$0xff] }
 0x2a0   : > { %v1576_v39 = vmul.f32 %v1574_v37, %v1574_v37  ;;  %v1592_v53 = vld [vmem:[#allocation2 + $0x20] sm:$0xff]  ;;  %v1593_v55 = vld [vmem:[#allocation2 + $0x28] sm:$0xff] }
 0x2a2   : > { %v1577_v40 = vsub.f32 %v1575_v38, %v1576_v39 }
 0x2a4   : > { %v1578_v41 = vmax.f32 %v1577_v40, 0.0 }
 0x2a6   : > { %v1579_v42 = vadd.f32 1e-05, %v1578_v41 }
 0x2a8   : > { %2311 = vrsqrt.f32 %v1579_v42 }
 0x2b5   : > { %v2312_v44 = vpop.eup %2311 }
 0x2b6   : > { %v1581_v45 = vmul.f32 %v2312_v44, %v1572_v43 }
 0x2b8   : > { %1584 = vst [vmem:[#allocation3 + $0x6] sm:$0x1] %v1581_v45  ;;  %v1582_v47 = vmul.f32 %v1581_v45, %v1574_v37 }
 0x2ba   : > { %v1583_v48 = vsub.f32 %v1573_v46, %v1582_v47 }
 0x2bc   : > { %1585 = vst [vmem:[#allocation3 + $0x7] sm:$0x1] %v1583_v48 }
 0x2bf   : > { %v1800_v56 = vld [vmem:[#allocation3 + $0x6] ss:$0 sm:$0xff] }
 0x2c0   : > { %v1599_v58 = vmul.f32 %v1800_v56, %v1588_v49  ;;  %v1600_v59 = vmul.f32 %v1800_v56, %v1589_v50  ;;  %v1601_v61 = vmul.f32 %v1800_v56, %v1590_v51  ;;  %v1602_v60 = vmul.f32 %v1800_v56, %v1591_v52 }
 0x2c1   : > { %v1603_v57 = vmul.f32 %v1800_v56, %v1592_v53  ;;  %v1604_v62 = vmul.f32 %v1800_v56, %v1593_v55 }
 0x2c3   : > { %v1801_v63 = vld [vmem:[#allocation3 + $0x7] ss:$0 sm:$0xff] }
 0x2c4   : > { %v1610_v0 = vadd.f32 %v1801_v63, %v1599_v58  ;;  %v1611_v1 = vadd.f32 %v1801_v63, %v1600_v59  ;;  %v1612_v2 = vadd.f32 %v1801_v63, %v1601_v61  ;;  %v1613_v3 = vadd.f32 %v1801_v63, %v1602_v60 }
 0x2c5   : > { %v1614_v4 = vadd.f32 %v1801_v63, %v1603_v57  ;;  %v1615_v5 = vadd.f32 %v1801_v63, %v1604_v62 }
 0x2c6   : > { %v1616_v6 = vmax.f32 %v1610_v0, 0.0  ;;  %v1617_v7 = vmax.f32 %v1611_v1, 0.0  ;;  %v1618_v9 = vmax.f32 %v1612_v2, 0.0  ;;  %v1619_v10 = vmax.f32 %v1613_v3, 0.0 }
 0x2c7   : > { %v1620_v11 = vmax.f32 %v1614_v4, 0.0  ;;  %v1621_v12 = vmax.f32 %v1615_v5, 0.0 }
 0x2c8   : > { %1622 = vst [vmem:[%s2928_s9 - $0x1] sm:$0xfe] %v1616_v6  ;;  %1623 = vst [vmem:[%s2928_s9 + $0x7] sm:$0xff] %v1617_v7 }
 0x2c9   : > { %1624 = vst [vmem:[%s2928_s9 + $0xf] sm:$0x1] %v1618_v9  ;;  %1802 = vst [vmem:[%s2928_s9 + $0xf] sm:$0xfe] %v1619_v10 }
 0x2ca   : > { %1803 = vst [vmem:[%s2928_s9 + $0x17] sm:$0xff] %v1620_v11  ;;  %1804 = vst [vmem:[%s2928_s9 + $0x1f] sm:$0x1] %v1621_v12 }
 0x2cb PF: > { %s19_s11 = sadd.s32 1, %s2335_s11   ;;  %s2929_s30 = smov %s2331_s10 }
 0x2cc   : > { %p16_p8 = scmp.ge.s32.totalorder %s19_s11, 5   ;;  %s2930_s10 = smov %s2932_s12 }
 0x2ce   :  { %18 = sbr.rel (!%p16_p8) target bundleno = 2 (0x2), region = 118 }

</bundles_post_ra>
